<compile_context>
chip_gen: v7x
topology: tpu7x:2x2x1
jax: 0.10.0
libtpu: 0.0.40
codegen_flags: <defaults>
</compile_context>

<pallas_src>
import jax
import jax.numpy as jnp
from jax.experimental import pallas as pl
from jax.experimental.pallas import tpu as pltpu

IN_CHANNELS = 2
CHANNELS = 8
KSIZE = 3
STRIDE = 2
H_IN = W_IN = 33            # (33 - 3)//2 + 1 = 16
OH = OW = 16
NUM_CLASSES = 10
NUM_OUT_PAD = 128           # lane-dense output block; classes in lanes 0..9
V_TH = 1.0
BN_EPS = 1e-5

K_FEAT = IN_CHANNELS * KSIZE * KSIZE      # 18
NPOS = OH * OW                            # 256


# ---------------------------------------------------------------- kernel ----
def _fused_net_kernel(pt_ref, wcs_ref, bias_ref, w2_ref, b_ref, o_ref):
    # pt_ref:   (18, nb*256)   im2col patches, feature-major; per-sample 256-chunks
    # wcs_ref:  (8, 18)        conv weight with BN scale folded in
    # bias_ref: (8, 1)         folded eval-mode BN bias
    # w2_ref:   (8, 256, 128)  linear weight, flatten perm folded, padded classes
    # b_ref:    (1, 128)       linear bias (zero padded past class 10)
    # o_ref:    (nb, 128)      output spikes (classes in lanes 0..9)
    nb = o_ref.shape[0]

    # Conv-as-GEMM (+BN) + IF spike: one MXU matmul, lane-dense N = nb*256.
    conv = jnp.dot(wcs_ref[...], pt_ref[...],
                   preferred_element_type=jnp.float32)            # (8, nb*256)
    spikes = ((conv + bias_ref[...]) >= V_TH).astype(jnp.float32)  # (8, nb*256)
    spikes = spikes.reshape(CHANNELS, nb, NPOS)                    # (8, nb, 256)

    # Linear + IF spike: 8 matmuls with M = nb (batch fills MXU rows).
    z = jnp.zeros((nb, NUM_OUT_PAD), dtype=jnp.float32)
    for c in range(CHANNELS):
        z = z + jnp.dot(spikes[c], w2_ref[c],
                        preferred_element_type=jnp.float32)        # (nb, 128)
    z = z + b_ref[...]
    o_ref[...] = (z >= V_TH).astype(o_ref.dtype)                   # one full store


# ------------------------------------------------------------------- glue ---
def _im2col_t(x, k, stride):
    # x: (N, C, H, W) -> (N, C*k*k, OH*OW) with feature order (c, kh, kw)
    n, c, h, w = x.shape
    oh = (h - k) // stride + 1
    ow = (w - k) // stride + 1
    cols = []
    for kh in range(k):
        for kw in range(k):
            cols.append(x[:, :, kh:kh + stride * oh:stride,
                             kw:kw + stride * ow:stride])        # (N, C, oh, ow)
    p = jnp.stack(cols, axis=2)                                   # (N, C, k*k, oh, ow)
    return p.reshape(n, c * k * k, oh * ow)


def _choose_block(n):
    # Round batch up to a multiple of 8 (sublane constraint on the output
    # block).  Target ~256 samples/step (fills v6e/v7x MXU rows), but keep at
    # least 2 grid steps when the batch allows so v7x's two TensorCores both
    # get work (dimension_semantics=("parallel",)).
    n8 = ((n + 7) // 8) * 8
    if n8 <= 16:
        nb = n8
    else:
        nb = min(256, ((n8 // 2) + 7) // 8 * 8)
    n_pad = ((n8 + nb - 1) // nb) * nb
    return nb, n_pad


@jax.jit
def net_forward(x, params):
    n = x.shape[0]
    nb, n_pad = _choose_block(n)

    # Fold eval-mode BN into the conv weight (scale) and a per-channel bias.
    inv_std = 1.0 / jnp.sqrt(params["bn_var"] + BN_EPS)
    scale = params["bn_gamma"] * inv_std                            # (8,)
    bias = (params["bn_beta"] - params["bn_mean"] * scale).reshape(CHANNELS, 1)
    wcs = params["conv_w"].reshape(CHANNELS, K_FEAT) * scale[:, None]   # (8, 18)

    # im2col, then lay out feature-major: (18, n_pad*256), per-sample chunks.
    patches = _im2col_t(x, KSIZE, STRIDE)                           # (N, 18, 256)
    if n_pad != n:
        patches = jnp.pad(patches, ((0, n_pad - n), (0, 0), (0, 0)))
    patches_t = patches.transpose(1, 0, 2).reshape(K_FEAT, n_pad * NPOS)

    # Fold PyTorch's NCHW flatten (feature index = c*256 + p) into the linear
    # weight; pad classes 10 -> 128 with zeros for a lane-dense output store.
    w2 = (params["lin_w"].reshape(NUM_CLASSES, CHANNELS, NPOS)
          .transpose(1, 2, 0))                                      # (8, 256, 10)
    w2 = jnp.pad(w2, ((0, 0), (0, 0), (0, NUM_OUT_PAD - NUM_CLASSES)))
    lin_b = jnp.pad(params["lin_b"], (0, NUM_OUT_PAD - NUM_CLASSES)
                    ).reshape(1, NUM_OUT_PAD)

    cost = pl.CostEstimate(
        flops=2 * n_pad * (CHANNELS * K_FEAT * NPOS
                           + CHANNELS * NPOS * NUM_OUT_PAD),
        transcendentals=0,
        bytes_accessed=4 * (patches_t.size + wcs.size + bias.size
                            + w2.size + lin_b.size + n_pad * NUM_OUT_PAD))

    out = pl.pallas_call(
        _fused_net_kernel,
        out_shape=jax.ShapeDtypeStruct((n_pad, NUM_OUT_PAD), jnp.float32),
        grid=(n_pad // nb,),
        in_specs=[
            pl.BlockSpec((K_FEAT, nb * NPOS), lambda i: (0, i)),
            pl.BlockSpec((CHANNELS, K_FEAT), lambda i: (0, 0)),
            pl.BlockSpec((CHANNELS, 1), lambda i: (0, 0)),
            pl.BlockSpec((CHANNELS, NPOS, NUM_OUT_PAD), lambda i: (0, 0, 0)),
            pl.BlockSpec((1, NUM_OUT_PAD), lambda i: (0, 0)),
        ],
        out_specs=pl.BlockSpec((nb, NUM_OUT_PAD), lambda i: (i, 0)),
        compiler_params=pltpu.CompilerParams(
            dimension_semantics=("parallel",),
            vmem_limit_bytes=48 * 1024 * 1024),
        cost_estimate=cost,
    )(patches_t, wcs, bias, w2, lin_b)
    return out[:n, :NUM_CLASSES]


# -------------------------------------------------------------- reference ---
def net_forward_reference(x, params):
    y = jax.lax.conv_general_dilated(
        x, params["conv_w"], (STRIDE, STRIDE), "VALID",
        dimension_numbers=("NCHW", "OIHW", "NCHW"))
    inv_std = 1.0 / jnp.sqrt(params["bn_var"] + BN_EPS)
    y = ((y - params["bn_mean"][None, :, None, None])
         * (params["bn_gamma"] * inv_std)[None, :, None, None]
         + params["bn_beta"][None, :, None, None])
    s1 = (y >= V_TH).astype(jnp.float32)
    f = s1.reshape(x.shape[0], -1)
    z = f @ params["lin_w"].T + params["lin_b"]
    return (z >= V_TH).astype(jnp.float32)


# ------------------------------------------------------------------- main ---
if __name__ == "__main__":
    key = jax.random.PRNGKey(0)
    k_x, k_cw, k_lw, k_lb, k_g, k_b, k_m, k_v = jax.random.split(key, 8)

    N = 2
    x = jax.random.normal(k_x, (N, IN_CHANNELS, H_IN, W_IN), dtype=jnp.float32)

    params = {
        "conv_w": 0.3 * jax.random.normal(
            k_cw, (CHANNELS, IN_CHANNELS, KSIZE, KSIZE), dtype=jnp.float32),
        "bn_gamma": 1.0 + 0.1 * jax.random.normal(k_g, (CHANNELS,), dtype=jnp.float32),
        "bn_beta": 0.1 * jax.random.normal(k_b, (CHANNELS,), dtype=jnp.float32),
        "bn_mean": 0.1 * jax.random.normal(k_m, (CHANNELS,), dtype=jnp.float32),
        "bn_var": 1.0 + 0.1 * jax.random.uniform(k_v, (CHANNELS,), dtype=jnp.float32),
        "lin_w": (1.0 / jnp.sqrt(16.0 * 16.0 * CHANNELS)) * jax.random.normal(
            k_lw, (NUM_CLASSES, 16 * 16 * CHANNELS), dtype=jnp.float32),
        "lin_b": 0.05 * jax.random.normal(k_lb, (NUM_CLASSES,), dtype=jnp.float32),
    }

    out = jax.block_until_ready(net_forward(x, params))
    ref = jax.block_until_ready(net_forward_reference(x, params))

    assert out.shape == (N, NUM_CLASSES), out.shape
    assert jnp.allclose(out, ref, atol=1e-5), "mismatch vs pure-JAX reference"
    print("KERNEL_OK")
</pallas_src>

<mosaic_0001>
module attributes {stable_mosaic.version = 11 : i64} {
  func.func @_fused_net_kernel(%arg0: i32, %arg1: memref<18x2048xf32, #tpu.memory_space<vmem>>, %arg2: memref<8x18xf32, #tpu.memory_space<vmem>>, %arg3: memref<8x1xf32, #tpu.memory_space<vmem>>, %arg4: memref<8x256x128xf32, #tpu.memory_space<vmem>>, %arg5: memref<1x128xf32, #tpu.memory_space<vmem>>, %arg6: memref<8x128xf32, #tpu.memory_space<vmem>>) attributes {dimension_semantics = [#tpu.dimension_semantics<parallel>], iteration_bounds = array<i64: 1>, scalar_prefetch = 0 : i64, scratch_operands = 0 : i64, tpu.core_type = #tpu.core_type<tc>, window_params = [{transform_indices = @transform_0, window_bounds = array<i64: 18, 2048>}, {pipeline_mode = #tpu.pipeline_mode<synchronous>, transform_indices = @transform_1, window_bounds = array<i64: 8, 18>}, {pipeline_mode = #tpu.pipeline_mode<synchronous>, transform_indices = @transform_2, window_bounds = array<i64: 8, 1>}, {pipeline_mode = #tpu.pipeline_mode<synchronous>, transform_indices = @transform_3, window_bounds = array<i64: 8, 256, 128>}, {pipeline_mode = #tpu.pipeline_mode<synchronous>, transform_indices = @transform_4, window_bounds = array<i64: 1, 128>}, {transform_indices = @transform_5, window_bounds = array<i64: 8, 128>}]} {
    %c0 = arith.constant 0 : index
    %c0_0 = arith.constant 0 : index
    %0 = vector.load %arg2[%c0, %c0_0] : memref<8x18xf32, #tpu.memory_space<vmem>>, vector<8x18xf32>
    %c0_1 = arith.constant 0 : index
    %c0_2 = arith.constant 0 : index
    %1 = vector.load %arg1[%c0_1, %c0_2] : memref<18x2048xf32, #tpu.memory_space<vmem>>, vector<18x2048xf32>
    %cst = arith.constant dense<0.000000e+00> : vector<8x2048xf32>
    %2 = tpu.matmul %0, %1, %cst {dimension_numbers = #tpu.dot_dimension_numbers<[1], [0], [0], [1], [0, 0, 1, 1], [], []>} : vector<8x18xf32>, vector<18x2048xf32>, vector<8x2048xf32> -> vector<8x2048xf32>
    %c0_3 = arith.constant 0 : index
    %c0_4 = arith.constant 0 : index
    %3 = vector.load %arg3[%c0_3, %c0_4] : memref<8x1xf32, #tpu.memory_space<vmem>>, vector<8x1xf32>
    %4 = vector.broadcast %3 : vector<8x1xf32> to vector<8x2048xf32>
    %5 = arith.addf %2, %4 : vector<8x2048xf32>
    %cst_5 = arith.constant 1.000000e+00 : f32
    %6 = vector.broadcast %cst_5 : f32 to vector<8x2048xf32>
    %7 = arith.cmpf oge, %5, %6 : vector<8x2048xf32>
    %8 = arith.extui %7 : vector<8x2048xi1> to vector<8x2048xi32>
    %9 = arith.sitofp %8 : vector<8x2048xi32> to vector<8x2048xf32>
    %10 = vector.shape_cast %9 : vector<8x2048xf32> to vector<8x8x256xf32>
    %cst_6 = arith.constant 0.000000e+00 : f32
    %11 = vector.broadcast %cst_6 : f32 to vector<8x128xf32>
    %12 = vector.extract_strided_slice %10 {offsets = [0, 0, 0], sizes = [1, 8, 256], strides = [1, 1, 1]} : vector<8x8x256xf32> to vector<1x8x256xf32>
    %13 = vector.shape_cast %12 : vector<1x8x256xf32> to vector<8x256xf32>
    %c0_7 = arith.constant 0 : index
    %c0_8 = arith.constant 0 : index
    %c0_9 = arith.constant 0 : index
    %14 = vector.load %arg4[%c0_7, %c0_8, %c0_9] : memref<8x256x128xf32, #tpu.memory_space<vmem>>, vector<1x256x128xf32>
    %15 = vector.shape_cast %14 : vector<1x256x128xf32> to vector<256x128xf32>
    %cst_10 = arith.constant dense<0.000000e+00> : vector<8x128xf32>
    %16 = tpu.matmul %13, %15, %cst_10 {dimension_numbers = #tpu.dot_dimension_numbers<[1], [0], [0], [1], [0, 0, 1, 1], [], []>} : vector<8x256xf32>, vector<256x128xf32>, vector<8x128xf32> -> vector<8x128xf32>
    %17 = arith.addf %11, %16 : vector<8x128xf32>
    %18 = vector.extract_strided_slice %10 {offsets = [1, 0, 0], sizes = [1, 8, 256], strides = [1, 1, 1]} : vector<8x8x256xf32> to vector<1x8x256xf32>
    %19 = vector.shape_cast %18 : vector<1x8x256xf32> to vector<8x256xf32>
    %c1 = arith.constant 1 : index
    %c0_11 = arith.constant 0 : index
    %c0_12 = arith.constant 0 : index
    %20 = vector.load %arg4[%c1, %c0_11, %c0_12] : memref<8x256x128xf32, #tpu.memory_space<vmem>>, vector<1x256x128xf32>
    %21 = vector.shape_cast %20 : vector<1x256x128xf32> to vector<256x128xf32>
    %cst_13 = arith.constant dense<0.000000e+00> : vector<8x128xf32>
    %22 = tpu.matmul %19, %21, %cst_13 {dimension_numbers = #tpu.dot_dimension_numbers<[1], [0], [0], [1], [0, 0, 1, 1], [], []>} : vector<8x256xf32>, vector<256x128xf32>, vector<8x128xf32> -> vector<8x128xf32>
    %23 = arith.addf %17, %22 : vector<8x128xf32>
    %24 = vector.extract_strided_slice %10 {offsets = [2, 0, 0], sizes = [1, 8, 256], strides = [1, 1, 1]} : vector<8x8x256xf32> to vector<1x8x256xf32>
    %25 = vector.shape_cast %24 : vector<1x8x256xf32> to vector<8x256xf32>
    %c2 = arith.constant 2 : index
    %c0_14 = arith.constant 0 : index
    %c0_15 = arith.constant 0 : index
    %26 = vector.load %arg4[%c2, %c0_14, %c0_15] : memref<8x256x128xf32, #tpu.memory_space<vmem>>, vector<1x256x128xf32>
    %27 = vector.shape_cast %26 : vector<1x256x128xf32> to vector<256x128xf32>
    %cst_16 = arith.constant dense<0.000000e+00> : vector<8x128xf32>
    %28 = tpu.matmul %25, %27, %cst_16 {dimension_numbers = #tpu.dot_dimension_numbers<[1], [0], [0], [1], [0, 0, 1, 1], [], []>} : vector<8x256xf32>, vector<256x128xf32>, vector<8x128xf32> -> vector<8x128xf32>
    %29 = arith.addf %23, %28 : vector<8x128xf32>
    %30 = vector.extract_strided_slice %10 {offsets = [3, 0, 0], sizes = [1, 8, 256], strides = [1, 1, 1]} : vector<8x8x256xf32> to vector<1x8x256xf32>
    %31 = vector.shape_cast %30 : vector<1x8x256xf32> to vector<8x256xf32>
    %c3 = arith.constant 3 : index
    %c0_17 = arith.constant 0 : index
    %c0_18 = arith.constant 0 : index
    %32 = vector.load %arg4[%c3, %c0_17, %c0_18] : memref<8x256x128xf32, #tpu.memory_space<vmem>>, vector<1x256x128xf32>
    %33 = vector.shape_cast %32 : vector<1x256x128xf32> to vector<256x128xf32>
    %cst_19 = arith.constant dense<0.000000e+00> : vector<8x128xf32>
    %34 = tpu.matmul %31, %33, %cst_19 {dimension_numbers = #tpu.dot_dimension_numbers<[1], [0], [0], [1], [0, 0, 1, 1], [], []>} : vector<8x256xf32>, vector<256x128xf32>, vector<8x128xf32> -> vector<8x128xf32>
    %35 = arith.addf %29, %34 : vector<8x128xf32>
    %36 = vector.extract_strided_slice %10 {offsets = [4, 0, 0], sizes = [1, 8, 256], strides = [1, 1, 1]} : vector<8x8x256xf32> to vector<1x8x256xf32>
    %37 = vector.shape_cast %36 : vector<1x8x256xf32> to vector<8x256xf32>
    %c4 = arith.constant 4 : index
    %c0_20 = arith.constant 0 : index
    %c0_21 = arith.constant 0 : index
    %38 = vector.load %arg4[%c4, %c0_20, %c0_21] : memref<8x256x128xf32, #tpu.memory_space<vmem>>, vector<1x256x128xf32>
    %39 = vector.shape_cast %38 : vector<1x256x128xf32> to vector<256x128xf32>
    %cst_22 = arith.constant dense<0.000000e+00> : vector<8x128xf32>
    %40 = tpu.matmul %37, %39, %cst_22 {dimension_numbers = #tpu.dot_dimension_numbers<[1], [0], [0], [1], [0, 0, 1, 1], [], []>} : vector<8x256xf32>, vector<256x128xf32>, vector<8x128xf32> -> vector<8x128xf32>
    %41 = arith.addf %35, %40 : vector<8x128xf32>
    %42 = vector.extract_strided_slice %10 {offsets = [5, 0, 0], sizes = [1, 8, 256], strides = [1, 1, 1]} : vector<8x8x256xf32> to vector<1x8x256xf32>
    %43 = vector.shape_cast %42 : vector<1x8x256xf32> to vector<8x256xf32>
    %c5 = arith.constant 5 : index
    %c0_23 = arith.constant 0 : index
    %c0_24 = arith.constant 0 : index
    %44 = vector.load %arg4[%c5, %c0_23, %c0_24] : memref<8x256x128xf32, #tpu.memory_space<vmem>>, vector<1x256x128xf32>
    %45 = vector.shape_cast %44 : vector<1x256x128xf32> to vector<256x128xf32>
    %cst_25 = arith.constant dense<0.000000e+00> : vector<8x128xf32>
    %46 = tpu.matmul %43, %45, %cst_25 {dimension_numbers = #tpu.dot_dimension_numbers<[1], [0], [0], [1], [0, 0, 1, 1], [], []>} : vector<8x256xf32>, vector<256x128xf32>, vector<8x128xf32> -> vector<8x128xf32>
    %47 = arith.addf %41, %46 : vector<8x128xf32>
    %48 = vector.extract_strided_slice %10 {offsets = [6, 0, 0], sizes = [1, 8, 256], strides = [1, 1, 1]} : vector<8x8x256xf32> to vector<1x8x256xf32>
    %49 = vector.shape_cast %48 : vector<1x8x256xf32> to vector<8x256xf32>
    %c6 = arith.constant 6 : index
    %c0_26 = arith.constant 0 : index
    %c0_27 = arith.constant 0 : index
    %50 = vector.load %arg4[%c6, %c0_26, %c0_27] : memref<8x256x128xf32, #tpu.memory_space<vmem>>, vector<1x256x128xf32>
    %51 = vector.shape_cast %50 : vector<1x256x128xf32> to vector<256x128xf32>
    %cst_28 = arith.constant dense<0.000000e+00> : vector<8x128xf32>
    %52 = tpu.matmul %49, %51, %cst_28 {dimension_numbers = #tpu.dot_dimension_numbers<[1], [0], [0], [1], [0, 0, 1, 1], [], []>} : vector<8x256xf32>, vector<256x128xf32>, vector<8x128xf32> -> vector<8x128xf32>
    %53 = arith.addf %47, %52 : vector<8x128xf32>
    %54 = vector.extract_strided_slice %10 {offsets = [7, 0, 0], sizes = [1, 8, 256], strides = [1, 1, 1]} : vector<8x8x256xf32> to vector<1x8x256xf32>
    %55 = vector.shape_cast %54 : vector<1x8x256xf32> to vector<8x256xf32>
    %c7 = arith.constant 7 : index
    %c0_29 = arith.constant 0 : index
    %c0_30 = arith.constant 0 : index
    %56 = vector.load %arg4[%c7, %c0_29, %c0_30] : memref<8x256x128xf32, #tpu.memory_space<vmem>>, vector<1x256x128xf32>
    %57 = vector.shape_cast %56 : vector<1x256x128xf32> to vector<256x128xf32>
    %cst_31 = arith.constant dense<0.000000e+00> : vector<8x128xf32>
    %58 = tpu.matmul %55, %57, %cst_31 {dimension_numbers = #tpu.dot_dimension_numbers<[1], [0], [0], [1], [0, 0, 1, 1], [], []>} : vector<8x256xf32>, vector<256x128xf32>, vector<8x128xf32> -> vector<8x128xf32>
    %59 = arith.addf %53, %58 : vector<8x128xf32>
    %c0_32 = arith.constant 0 : index
    %c0_33 = arith.constant 0 : index
    %60 = vector.load %arg5[%c0_32, %c0_33] : memref<1x128xf32, #tpu.memory_space<vmem>>, vector<1x128xf32>
    %61 = vector.broadcast %60 : vector<1x128xf32> to vector<8x128xf32>
    %62 = arith.addf %59, %61 : vector<8x128xf32>
    %cst_34 = arith.constant 1.000000e+00 : f32
    %63 = vector.broadcast %cst_34 : f32 to vector<8x128xf32>
    %64 = arith.cmpf oge, %62, %63 : vector<8x128xf32>
    %65 = arith.extui %64 : vector<8x128xi1> to vector<8x128xi32>
    %66 = arith.sitofp %65 : vector<8x128xi32> to vector<8x128xf32>
    %c0_35 = arith.constant 0 : index
    %c0_36 = arith.constant 0 : index
    %67 = vector.load %arg6[%c0_35, %c0_36] : memref<8x128xf32, #tpu.memory_space<vmem>>, vector<8x128xf32>
    tpu.vector_store %arg6[%c0_35, %c0_36], %66 {strides = array<i32>} : memref<8x128xf32, #tpu.memory_space<vmem>>, vector<8x128xf32>,
    return
  }
  func.func @transform_0(%arg0: i32) -> (i32, i32) {
    %c0_i32 = arith.constant 0 : i32
    %c0_i32_0 = arith.constant 0 : i32
    return %c0_i32, %arg0 : i32, i32
  }
  func.func @transform_1(%arg0: i32) -> (i32, i32) {
    %c0_i32 = arith.constant 0 : i32
    %c0_i32_0 = arith.constant 0 : i32
    %c0_i32_1 = arith.constant 0 : i32
    return %c0_i32, %c0_i32_0 : i32, i32
  }
  func.func @transform_2(%arg0: i32) -> (i32, i32) {
    %c0_i32 = arith.constant 0 : i32
    %c0_i32_0 = arith.constant 0 : i32
    %c0_i32_1 = arith.constant 0 : i32
    return %c0_i32, %c0_i32_0 : i32, i32
  }
  func.func @transform_3(%arg0: i32) -> (i32, i32, i32) {
    %c0_i32 = arith.constant 0 : i32
    %c0_i32_0 = arith.constant 0 : i32
    %c0_i32_1 = arith.constant 0 : i32
    %c0_i32_2 = arith.constant 0 : i32
    return %c0_i32, %c0_i32_0, %c0_i32_1 : i32, i32, i32
  }
  func.func @transform_4(%arg0: i32) -> (i32, i32) {
    %c0_i32 = arith.constant 0 : i32
    %c0_i32_0 = arith.constant 0 : i32
    %c0_i32_1 = arith.constant 0 : i32
    return %c0_i32, %c0_i32_0 : i32, i32
  }
  func.func @transform_5(%arg0: i32) -> (i32, i32) {
    %c0_i32 = arith.constant 0 : i32
    %c0_i32_0 = arith.constant 0 : i32
    return %arg0, %c0_i32 : i32, i32
  }
}

</mosaic_0001>

<bundles_post_ra>
// kernel: net_forward.1
= control target key start
LH: loop header
LB: loop body
LE: loop exit
PB: predicated region body
PF: predicated region fallthrough
CT: control target
= control target key end

     0   :  { %v2700_v3 = vmov 0.0   ;;  %v2701_v8 = vmov 0   ;;  %vm79_vm0 = vcmask 1041408   ;;  %vm75_vm1 = vcmask 146432   ;;  %s3872_s0 = inlined_call_operand.vmem [shape: f32[18,2048], index: 0, kind: input, shape index: {}]   ;;  %s3873_s1 = inlined_call_operand.vmem [shape: f32[8,18], index: 1, kind: input, shape index: {}]   ;;  %s3874_s2 = inlined_call_operand.vmem [shape: f32[8,1], index: 2, kind: input, shape index: {}]   ;;  %s3875_s3 = inlined_call_operand.vmem [shape: f32[8,256,128], index: 3, kind: input, shape index: {}]   ;;  %s3876_s4 = inlined_call_operand.vmem [shape: f32[1,128], index: 4, kind: input, shape index: {}]   ;;  %s3877_s5 = inlined_call_operand.vmem [shape: f32[8,128], index: 5, kind: output, shape index: {}]  }
   0x1   :  { %v22_v0 = vld [vmem:[%s3872_s0 + $0x8] sm:$0xff]  ;;  %v24_v2 = vld [vmem:[%s3872_s0 + $0x18] sm:$0xff]  ;;  %192 = vmatprep.mubr.f32.mxu0 %v2700_v3  ;;  %263 = vmatprep.mubr.f32.mxu1 %v2700_v3  ;;  %v21_v6 = vld [vmem:[%s3872_s0] sm:$0xff] }
   0x2   :  { %v38_v1 = vld [vmem:[%s3872_s0 + $0x88] sm:$0xff]  ;;  %v40_v5 = vld [vmem:[%s3872_s0 + $0x98] sm:$0xff]  ;;  %v37_v7 = vld [vmem:[%s3872_s0 + $0x80] sm:$0xff]  ;;  %2699 = vset.pattern.permute.xlu0 %v2701_v8 }
   0x3   :  { %v2407_v4 = vpack.c.bf16 %v38_v1, %v22_v0  ;;  %v2411_v9 = vpack.c.bf16 %v40_v5, %v24_v2  ;;  %v2409_v10 = vpack.c.bf16 %v37_v7, %v21_v6  ;;  %v23_v11 = vld [vmem:[%s3872_s0 + $0x10] sm:$0xff]  ;;  %v54_v13 = vld [vmem:[%s3872_s0 + $0x108] sm:$0x3]  ;;  %v56_v15 = vld [vmem:[%s3872_s0 + $0x118] sm:$0x3] }
   0x4   :  { %v39_v12 = vld [vmem:[%s3872_s0 + $0x90] sm:$0xff]  ;;  %v53_v16 = vld [vmem:[%s3872_s0 + $0x100] sm:$0x3]  ;;  %v26_v19 = vld [vmem:[%s3872_s0 + $0x28] sm:$0xff] }
   0x5   :  { %2408 = vmatprep.subr.bf16.mxu0 %v2407_v4  ;;  %v2413_v14 = vpack.c.bf16 %v39_v12, %v23_v11  ;;  %2412 = vmatprep.subr.bf16.mxu1 %v2411_v9  ;;  %v55_v17 = vld [vmem:[%s3872_s0 + $0x110] sm:$0x3]  ;;  %v2775_v18 = vld [vmem:[%s3873_s1] sm:$0xff]  ;;  %v42_v20 = vld [vmem:[%s3872_s0 + $0xa8] sm:$0xff] }
   0x6   :  { %2410 = vmatpush1.bf16.msra.mxu0 %v2409_v10  ;;  %v28_v21 = vld [vmem:[%s3872_s0 + $0x38] sm:$0xff]  ;;  %v25_v23 = vld [vmem:[%s3872_s0 + $0x20] sm:$0xff]  ;;  %v2415_v24 = vpack.c.bf16 %v42_v20, %v26_v19  ;;  %v27_v26 = vld [vmem:[%s3872_s0 + $0x30] sm:$0xff] }
   0x7   :  { %2414 = vmatpush1.bf16.msra.mxu1 %v2413_v14  ;;  %1861 = vmatprep.subr.msk.mxu0 %vm79_vm0, %v54_v13  ;;  %v44_v22 = vld [vmem:[%s3872_s0 + $0xb8] sm:$0xff]  ;;  %v41_v25 = vld [vmem:[%s3872_s0 + $0xa0] sm:$0xff]  ;;  %v43_v27 = vld [vmem:[%s3872_s0 + $0xb0] sm:$0xff] }
   0x8   :  { %1864 = vmatprep.subr.msk.mxu1 %vm79_vm0, %v56_v15  ;;  %v2419_v28 = vpack.c.bf16 %v44_v22, %v28_v21  ;;  %v2417_v29 = vpack.c.bf16 %v41_v25, %v25_v23  ;;  %v2421_v30 = vpack.c.bf16 %v43_v27, %v27_v26  ;;  %v58_v31 = vld [vmem:[%s3872_s0 + $0x128] sm:$0x3]  ;;  %v60_v32 = vld [vmem:[%s3872_s0 + $0x138] sm:$0x3]  ;;  %v29_v37 = vld [vmem:[%s3872_s0 + $0x40] sm:$0xff] }
   0x9   :  { %v30_v33 = vld [vmem:[%s3872_s0 + $0x48] sm:$0xff]  ;;  %v32_v35 = vld [vmem:[%s3872_s0 + $0x58] sm:$0xff]  ;;  %v45_v38 = vld [vmem:[%s3872_s0 + $0xc0] sm:$0xff] }
   0xa   :  { %1862 = vmatpush1.msk.msra.mxu0 %vm79_vm0, %v53_v16  ;;  %v46_v34 = vld [vmem:[%s3872_s0 + $0xc8] sm:$0xff]  ;;  %v48_v36 = vld [vmem:[%s3872_s0 + $0xd8] sm:$0xff]  ;;  %v57_v39 = vld [vmem:[%s3872_s0 + $0x120] sm:$0x3]  ;;  %v2425_v45 = vpack.c.bf16 %v45_v38, %v29_v37 }
   0xb   :  { %1865 = vmatpush1.msk.msra.mxu1 %vm79_vm0, %v55_v17  ;;  %1863 = vmatmul.mubr.msk.f32.vlgmr.msra.gmra.mrb[0].mxu0 %vm75_vm1, %v2775_v18  ;;  %v31_v40 = vld [vmem:[%s3872_s0 + $0x50] sm:$0xff]  ;;  %v2423_v43 = vpack.c.bf16 %v46_v34, %v30_v33  ;;  %v2427_v44 = vpack.c.bf16 %v48_v36, %v32_v35  ;;  %v62_v47 = vld [vmem:[%s3872_s0 + $0x148] sm:$0x3]  ;;  %v64_v48 = vld [vmem:[%s3872_s0 + $0x158] sm:$0x3] }
   0xc   :  { %1866 = vmatmul.mubr.msk.f32.vlgmr.msra.gmra.mrb[0].mxu1 %vm75_vm1, %v2775_v18  ;;  %2416 = vmatprep.subr.bf16.mxu0 %v2415_v24  ;;  %v47_v41 = vld [vmem:[%s3872_s0 + $0xd0] sm:$0xff]  ;;  %v34_v49 = vld [vmem:[%s3872_s0 + $0x68] sm:$0xff]  ;;  %v36_v51 = vld [vmem:[%s3872_s0 + $0x78] sm:$0xff] }
   0xd   :  { %2420 = vmatprep.subr.bf16.mxu1 %v2419_v28  ;;  %2418 = vmatpush1.bf16.msra.mxu0 %v2417_v29  ;;  %v59_v42 = vld [vmem:[%s3872_s0 + $0x130] sm:$0x3]  ;;  %v2429_v46 = vpack.c.bf16 %v47_v41, %v31_v40  ;;  %v50_v50 = vld [vmem:[%s3872_s0 + $0xe8] sm:$0xff]  ;;  %v52_v52 = vld [vmem:[%s3872_s0 + $0xf8] sm:$0xff] }
   0xe   :  { %2422 = vmatpush1.bf16.msra.mxu1 %v2421_v30  ;;  %1867 = vmatprep.subr.msk.mxu0 %vm79_vm0, %v58_v31  ;;  %v33_v53 = vld [vmem:[%s3872_s0 + $0x60] sm:$0xff]  ;;  %v35_v57 = vld [vmem:[%s3872_s0 + $0x70] sm:$0xff]  ;;  %v2431_v60 = vpack.c.bf16 %v50_v50, %v34_v49  ;;  %v2435_v61 = vpack.c.bf16 %v52_v52, %v36_v51  ;;  %v66_v0 = vld [vmem:[%s3872_s0 + $0x168] sm:$0x3] }
   0xf   :  { %1870 = vmatprep.subr.msk.mxu1 %vm79_vm0, %v60_v32  ;;  %334 = vmatprep.mubr.f32.mxu0 %v2700_v3  ;;  %v49_v54 = vld [vmem:[%s3872_s0 + $0xe0] sm:$0xff]  ;;  %v51_v58 = vld [vmem:[%s3872_s0 + $0xf0] sm:$0xff]  ;;  %v68_v1 = vld [vmem:[%s3872_s0 + $0x178] sm:$0x3] }
  0x10   :  { %405 = vmatprep.mubr.f32.mxu1 %v2700_v3  ;;  %v69_v55 = vld [vmem:[%s3874_s2] sm:$0xff]  ;;  %v63_v59 = vld [vmem:[%s3872_s0 + $0x150] sm:$0x3]  ;;  %v2433_v62 = vpack.c.bf16 %v49_v54, %v33_v53  ;;  %v2437_v63 = vpack.c.bf16 %v51_v58, %v35_v57  ;;  %v1918_v6 = vld [vmem:[%s3875_s3 + $0x188] sm:$0xff] }
  0x11   :  { %1868 = vmatpush1.msk.msra.mxu0 %vm79_vm0, %v57_v39  ;;  %v61_v56 = vld [vmem:[%s3872_s0 + $0x140] sm:$0x3]  ;;  %72 = vperm.xlu0 %2699, %v69_v55   ;;  %v67_v4 = vld [vmem:[%s3872_s0 + $0x170] sm:$0x3]  ;;  %v1033_v9 = vld [vmem:[%s3875_s3 + $0x88] sm:$0xff] }
  0x12   :  { %1871 = vmatpush1.msk.msra.mxu1 %vm79_vm0, %v59_v42  ;;  %1869 = vmatmul.mubr.msk.f32.vlgmr.msra.gmra.mrb[2].mxu0 %vm75_vm1, %v2775_v18  ;;  %v65_v2 = vld [vmem:[%s3872_s0 + $0x160] sm:$0x3]  ;;  %v1902_v11 = vld [vmem:[%s3875_s3 + $0x108] sm:$0xff]  ;;  %v1919_v17 = vld [vmem:[%s3875_s3 + $0x190] sm:$0xff] }
  0x13   :  { %1872 = vmatmul.mubr.msk.f32.vlgmr.msra.gmra.mrb[2].mxu1 %vm75_vm1, %v2775_v18  ;;  %2424 = vmatprep.subr.bf16.mxu0 %v2423_v43  ;;  %v1917_v5 = vld [vmem:[%s3875_s3 + $0x180] sm:$0xff]  ;;  %v1017_v15 = vld [vmem:[%s3875_s3 + $0x8] sm:$0xff]  ;;  %v1034_v19 = vld [vmem:[%s3875_s3 + $0x90] sm:$0xff] }
  0x14   :  { %2428 = vmatprep.subr.bf16.mxu1 %v2427_v44  ;;  %2426 = vmatpush1.bf16.msra.mxu0 %v2425_v45  ;;  %v1032_v7 = vld [vmem:[%s3875_s3 + $0x80] sm:$0xff]  ;;  %v2439_v8 = vpack.c.bf16 %v1918_v6, %v1917_v5  ;;  %v1035_v21 = vld [vmem:[%s3875_s3 + $0x98] sm:$0xff]  ;;  %v1903_v23 = vld [vmem:[%s3875_s3 + $0x110] sm:$0xff] }
  0x15   :  { %2430 = vmatpush1.bf16.msra.mxu1 %v2429_v46  ;;  %1873 = vmatprep.subr.msk.mxu0 %vm79_vm0, %v62_v47  ;;  %v1901_v10 = vld [vmem:[%s3875_s3 + $0x100] sm:$0xff]  ;;  %v2471_v12 = vpack.c.bf16 %v1033_v9, %v1032_v7  ;;  %v2475_v22 = vpack.c.bf16 %v1035_v21, %v1034_v19  ;;  %v1904_v24 = vld [vmem:[%s3875_s3 + $0x118] sm:$0xff]  ;;  %v1018_v25 = vld [vmem:[%s3875_s3 + $0x10] sm:$0xff] }
  0x16   :  { %1876 = vmatprep.subr.msk.mxu1 %vm79_vm0, %v64_v48  ;;  %476 = vmatprep.mubr.f32.mxu0 %v2700_v3  ;;  %v2441_v13 = vpack.c.bf16 %v1902_v11, %v1901_v10  ;;  %v1016_v14 = vld [vmem:[%s3875_s3] sm:$0xff]  ;;  %v2445_v26 = vpack.c.bf16 %v1904_v24, %v1903_v23  ;;  %v1019_v27 = vld [vmem:[%s3875_s3 + $0x18] sm:$0xff]  ;;  %v1922_v30 = vld [vmem:[%s3875_s3 + $0x1a8] sm:$0xff] }
  0x17   :  { %547 = vmatprep.mubr.f32.mxu1 %v2700_v3  ;;  %v2473_v16 = vpack.c.bf16 %v1017_v15, %v1016_v14  ;;  %v2477_v28 = vpack.c.bf16 %v1019_v27, %v1018_v25  ;;  %v1921_v29 = vld [vmem:[%s3875_s3 + $0x1a0] sm:$0xff]  ;;  %v1037_v33 = vld [vmem:[%s3875_s3 + $0xa8] sm:$0xff]  ;;  %v1923_v41 = vld [vmem:[%s3875_s3 + $0x1b0] sm:$0xff] }
  0x18   :  { %1874 = vmatpush1.msk.msra.mxu0 %vm79_vm0, %v61_v56  ;;  %v1036_v31 = vld [vmem:[%s3875_s3 + $0xa0] sm:$0xff]  ;;  %v2447_v32 = vpack.c.bf16 %v1922_v30, %v1921_v29  ;;  %v1906_v35 = vld [vmem:[%s3875_s3 + $0x128] sm:$0xff]  ;;  %v1924_v42 = vld [vmem:[%s3875_s3 + $0x1b8] sm:$0xff] }
  0x19   :  { %1877 = vmatpush1.msk.msra.mxu1 %vm79_vm0, %v63_v59  ;;  %1875 = vmatmul.mubr.msk.f32.vlgmr.msra.gmra.mrb[4].mxu0 %vm75_vm1, %v2775_v18  ;;  %v1905_v34 = vld [vmem:[%s3875_s3 + $0x120] sm:$0xff]  ;;  %v2479_v36 = vpack.c.bf16 %v1037_v33, %v1036_v31  ;;  %v1021_v39 = vld [vmem:[%s3875_s3 + $0x28] sm:$0xff]  ;;  %v1038_v43 = vld [vmem:[%s3875_s3 + $0xb0] sm:$0xff]  ;;  %v2451_v44 = vpack.c.bf16 %v1924_v42, %v1923_v41 }
  0x1a   :  { %1878 = vmatmul.mubr.msk.f32.vlgmr.msra.gmra.mrb[4].mxu1 %vm75_vm1, %v2775_v18  ;;  %2432 = vmatprep.subr.bf16.mxu0 %v2431_v60  ;;  %v2449_v37 = vpack.c.bf16 %v1906_v35, %v1905_v34  ;;  %v1020_v38 = vld [vmem:[%s3875_s3 + $0x20] sm:$0xff]  ;;  %v1039_v45 = vld [vmem:[%s3875_s3 + $0xb8] sm:$0xff]  ;;  %v1907_v46 = vld [vmem:[%s3875_s3 + $0x130] sm:$0xff] }
  0x1b   :  { %2436 = vmatprep.subr.bf16.mxu1 %v2435_v61  ;;  %2434 = vmatpush1.bf16.msra.mxu0 %v2433_v62  ;;  %v2481_v40 = vpack.c.bf16 %v1021_v39, %v1020_v38  ;;  %v1908_v47 = vld [vmem:[%s3875_s3 + $0x138] sm:$0xff]  ;;  %v2483_v48 = vpack.c.bf16 %v1039_v45, %v1038_v43  ;;  %v1022_v50 = vld [vmem:[%s3875_s3 + $0x30] sm:$0xff]  ;;  %v1925_v53 = vld [vmem:[%s3875_s3 + $0x1c0] sm:$0xff] }
  0x1c   :  { %2438 = vmatpush1.bf16.msra.mxu1 %v2437_v63  ;;  %1879 = vmatprep.subr.msk.mxu0 %vm79_vm0, %v66_v0  ;;  %v2453_v49 = vpack.c.bf16 %v1908_v47, %v1907_v46  ;;  %v1023_v51 = vld [vmem:[%s3875_s3 + $0x38] sm:$0xff]  ;;  %v1926_v54 = vld [vmem:[%s3875_s3 + $0x1c8] sm:$0xff]  ;;  %v1040_v55 = vld [vmem:[%s3875_s3 + $0xc0] sm:$0xff]  ;;  %v2702_v46 = vmov 1983009808  }
  0x1d   :  { %1882 = vmatprep.subr.msk.mxu1 %vm79_vm0, %v68_v1  ;;  %618 = vmatprep.mubr.f32.mxu0 %v2700_v3  ;;  %v2485_v52 = vpack.c.bf16 %v1023_v51, %v1022_v50  ;;  %v2455_v56 = vpack.c.bf16 %v1926_v54, %v1925_v53  ;;  %v1041_v57 = vld [vmem:[%s3875_s3 + $0xc8] sm:$0xff]  ;;  %v1909_v58 = vld [vmem:[%s3875_s3 + $0x140] sm:$0xff]  ;;  %v1927_v1 = vld [vmem:[%s3875_s3 + $0x1d0] sm:$0xff]  ;;  %v747_v47 = vunpack.c.l.s4 %v2702_v46 }
  0x1e   :  { %689 = vmatprep.mubr.f32.mxu1 %v2700_v3  ;;  %v1910_v59 = vld [vmem:[%s3875_s3 + $0x148] sm:$0xff]  ;;  %v2487_v60 = vpack.c.bf16 %v1041_v57, %v1040_v55  ;;  %v1024_v62 = vld [vmem:[%s3875_s3 + $0x40] sm:$0xff]  ;;  %v1043_v6 = vld [vmem:[%s3875_s3 + $0xd8] sm:$0xff]  ;;  %v2703_v57 = vmov 1934713408  }
  0x1f   :  { %1880 = vmatpush1.msk.msra.mxu0 %vm79_vm0, %v65_v2  ;;  %v2457_v61 = vpack.c.bf16 %v1910_v59, %v1909_v58  ;;  %v1025_v63 = vld [vmem:[%s3875_s3 + $0x48] sm:$0xff]  ;;  %v1928_v2 = vld [vmem:[%s3875_s3 + $0x1d8] sm:$0xff]  ;;  %v1911_v7 = vld [vmem:[%s3875_s3 + $0x150] sm:$0xff]  ;;  %v748_v54 = vunpack.c.0.s8 %v747_v47  ;;  %v811_v58 = vunpack.c.l.s4 %v2703_v57 }
  0x20   :  { %1883 = vmatpush1.msk.msra.mxu1 %vm79_vm0, %v67_v4  ;;  %1881 = vmatmul.mubr.msk.f32.vlgmr.msra.gmra.mrb[6].mxu0 %vm75_vm1, %v2775_v18  ;;  %v2489_v0 = vpack.c.bf16 %v1025_v63, %v1024_v62  ;;  %v1042_v4 = vld [vmem:[%s3875_s3 + $0xd0] sm:$0xff]  ;;  %v2459_v5 = vpack.c.bf16 %v1928_v2, %v1927_v1  ;;  %v1929_v14 = vld [vmem:[%s3875_s3 + $0x1e0] sm:$0xff]  ;;  %v1930_v15 = vld [vmem:[%s3875_s3 + $0x1e8] sm:$0xff] }
  0x21   :  { %1884 = vmatmul.mubr.msk.f32.vlgmr.msra.gmra.mrb[6].mxu1 %vm75_vm1, %v2775_v18  ;;  %2440 = vmatprep.subr.bf16.mxu0 %v2439_v8  ;;  %v1920_v18 = vld [vmem:[%s3875_s3 + $0x198] sm:$0xff]  ;;  %v2491_v9 = vpack.c.bf16 %v1043_v6, %v1042_v4  ;;  %v1026_v11 = vld [vmem:[%s3875_s3 + $0x50] sm:$0xff]  ;;  %v1913_v19 = vld [vmem:[%s3875_s3 + $0x160] sm:$0xff]  ;;  %v812_v4 = vunpack.c.0.s8 %v811_v58 }
  0x22   :  { %2472 = vmatprep.subr.bf16.mxu1 %v2471_v12  ;;  %2442 = vmatpush3.bf16.msra.mxu0 %v2441_v13  ;;  %v2443_v20 = vpack.c.bf16 %v1920_v18, %v1919_v17  ;;  %v1912_v8 = vld [vmem:[%s3875_s3 + $0x158] sm:$0xff]  ;;  %v2463_v17 = vpack.c.bf16 %v1930_v15, %v1929_v14  ;;  %v1045_v18 = vld [vmem:[%s3875_s3 + $0xe8] sm:$0xff]  ;;  %v1028_v23 = vld [vmem:[%s3875_s3 + $0x60] sm:$0xff] }
  0x23   :  { %2474 = vmatpush3.bf16.msra.mxu1 %v2473_v16  ;;  %v2461_v10 = vpack.c.bf16 %v1912_v8, %v1911_v7  ;;  %v1027_v12 = vld [vmem:[%s3875_s3 + $0x58] sm:$0xff]  ;;  %v1044_v16 = vld [vmem:[%s3875_s3 + $0xe0] sm:$0xff]  ;;  %v1029_v24 = vld [vmem:[%s3875_s3 + $0x68] sm:$0xff] }
  0x24   :  { %2444 = vmatprep.subr.bf16.mxu0 %v2443_v20  ;;  %2476 = vmatprep.subr.bf16.mxu1 %v2475_v22  ;;  %v2493_v13 = vpack.c.bf16 %v1027_v12, %v1026_v11  ;;  %v1914_v20 = vld [vmem:[%s3875_s3 + $0x168] sm:$0xff]  ;;  %v2495_v21 = vpack.c.bf16 %v1045_v18, %v1044_v16  ;;  %v2497_v25 = vpack.c.bf16 %v1029_v24, %v1028_v23  ;;  %v1932_v27 = vld [vmem:[%s3875_s3 + $0x1f8] sm:$0xff]  ;;  %v1915_v31 = vld [vmem:[%s3875_s3 + $0x170] sm:$0xff] }
  0x25   :  { %v2465_v22 = vpack.c.bf16 %v1914_v20, %v1913_v19  ;;  %v1047_v30 = vld [vmem:[%s3875_s3 + $0xf8] sm:$0xff]  ;;  %v1030_v35 = vld [vmem:[%s3875_s3 + $0x70] sm:$0xff]  ;;  %v1949_v38 = vld [vmem:[%s3875_s3 + $0x280] sm:$0xff] }
  0x26   :  { %2446 = vmatpush3.bf16.msra.mxu0 %v2445_v26  ;;  %v1931_v26 = vld [vmem:[%s3875_s3 + $0x1f0] sm:$0xff]  ;;  %v1950_v39 = vld [vmem:[%s3875_s3 + $0x288] sm:$0xff] }
  0x27   :  { %2478 = vmatpush3.bf16.msra.mxu1 %v2477_v28  ;;  %2448 = vmatprep.subr.bf16.mxu0 %v2447_v32  ;;  %v1046_v28 = vld [vmem:[%s3875_s3 + $0xf0] sm:$0xff]  ;;  %v2467_v29 = vpack.c.bf16 %v1932_v27, %v1931_v26  ;;  %v1916_v32 = vld [vmem:[%s3875_s3 + $0x178] sm:$0xff]  ;;  %v2503_v41 = vpack.c.bf16 %v1950_v39, %v1949_v38  ;;  %v1982_v42 = vld [vmem:[%s3875_s3 + $0x388] sm:$0xff] }
  0x28   :  { %2480 = vmatprep.subr.bf16.mxu1 %v2479_v36  ;;  %v2499_v33 = vpack.c.bf16 %v1047_v30, %v1046_v28  ;;  %v2469_v34 = vpack.c.bf16 %v1916_v32, %v1915_v31  ;;  %v1031_v36 = vld [vmem:[%s3875_s3 + $0x78] sm:$0xff] }
  0x2a   :  { %2450 = vmatpush3.bf16.msra.mxu0 %v2449_v37  ;;  %v2501_v37 = vpack.c.bf16 %v1031_v36, %v1030_v35  ;;  %v3169_v35 = vld [vmem:[%s3875_s3 + $0x208] sm:$0xff]  ;;  %v3174_v36 = vld [vmem:[%s3875_s3 + $0x300] sm:$0xff] }
  0x2b   :  { %2482 = vmatpush3.bf16.msra.mxu1 %v2481_v40  ;;  %2452 = vmatprep.subr.bf16.mxu0 %v2451_v44  ;;  %v1981_v40 = vld [vmem:[%s3875_s3 + $0x380] sm:$0xff] }
  0x2c   :  { %2484 = vmatprep.subr.bf16.mxu1 %v2483_v48  ;;  %v2535_v43 = vpack.c.bf16 %v1982_v42, %v1981_v40  ;;  %v749_v48 = vlaneseq }
  0x2e   :  { %2454 = vmatpush3.bf16.msra.mxu0 %v2453_v49  ;;  %v750_v55 = vshrl.u32 %v749_v48, 7 }
  0x2f   :  { %2486 = vmatpush3.bf16.msra.mxu1 %v2485_v52  ;;  %2456 = vmatprep.subr.bf16.mxu0 %v2455_v56 }
  0x30   :  { %2488 = vmatprep.subr.bf16.mxu1 %v2487_v60  ;;  %v3137_v62 = vsub.s32 %v748_v54, %v750_v55 }
  0x32   :  { %2458 = vmatpush3.bf16.msra.mxu0 %v2457_v61 }
  0x33   :  { %2490 = vmatpush3.bf16.msra.mxu1 %v2489_v0  ;;  %2460 = vmatprep.subr.bf16.mxu0 %v2459_v5 }
  0x34   :  { %2492 = vmatprep.subr.bf16.mxu1 %v2491_v9 }
  0x36   :  { %2462 = vmatpush3.bf16.msra.mxu0 %v2461_v10 }
  0x37   :  { %2494 = vmatpush3.bf16.msra.mxu1 %v2493_v13  ;;  %2464 = vmatprep.subr.bf16.mxu0 %v2463_v17 }
  0x38   :  { %2496 = vmatprep.subr.bf16.mxu1 %v2495_v21  ;;  %v3150_v21 = vsub.s32 %v812_v4, %v750_v55 }
  0x3a   :  { %2466 = vmatpush3.bf16.msra.mxu0 %v2465_v22 }
  0x3b   :  { %2498 = vmatpush3.bf16.msra.mxu1 %v2497_v25  ;;  %2468 = vmatprep.subr.bf16.mxu0 %v2467_v29  ;;  %v3160_v29 = vld [vmem:[%s3875_s3 + $0x200] sm:$0xff] }
  0x3c   :  { %2500 = vmatprep.subr.bf16.mxu1 %v2499_v33  ;;  %v2505_v48 = vpack.c.bf16 %v3169_v35, %v3160_v29  ;;  %v1969_v29 = vld [vmem:[%s3875_s3 + $0x320] sm:$0xff]  ;;  %v1970_v35 = vld [vmem:[%s3875_s3 + $0x328] sm:$0xff] }
  0x3e   :  { %2470 = vmatpush3.bf16.msra.mxu0 %v2469_v34 }
  0x3f   :  { %2502 = vmatpush3.bf16.msra.mxu1 %v2501_v37  ;;  %2504 = vmatprep.subr.bf16.mxu0 %v2503_v41  ;;  %v3179_v37 = vld [vmem:[%s3875_s3 + $0x308] sm:$0xff] }
  0x40   :  { %2536 = vmatprep.subr.bf16.mxu1 %v2535_v43 }
  0x90   :  { %v3130_v44 = vpop.permute.xlu0 %72 }
  0xde   :  { %v194_v45 = vpop.f32.mrb[0].mxu0 }
  0xdf   :  { %v265_v49 = vpop.f32.mrb[0].mxu1  ;;  %v196_v50 = vpop.f32.mrb[1].mxu0  ;;  %v195_v52 = vadd.f32 %v194_v45, %v3130_v44 }
  0xe0   :  { %v267_v51 = vpop.f32.mrb[1].mxu1  ;;  %v197_v53 = vadd.f32 %v196_v50, %v3130_v44  ;;  %v266_v56 = vadd.f32 %v265_v49, %v3130_v44  ;;  %v2537_v49 = vpack.c.bf16 %v3179_v37, %v3174_v36  ;;  %v1955_v36 = vld [vmem:[%s3875_s3 + $0x2b0] sm:$0xff]  ;;  %v1956_v37 = vld [vmem:[%s3875_s3 + $0x2b8] sm:$0xff] }
  0xe1   :  { %v268_v59 = vadd.f32 %v267_v51, %v3130_v44  ;;  %vm696_vm2 = vcmp.ge.f32.partialorder %v195_v52, 1.0 }
  0xe2   :  { %vm697_vm3 = vcmp.ge.f32.partialorder %v197_v53, 1.0  ;;  %vm698_vm4 = vcmp.ge.f32.partialorder %v266_v56, 1.0  ;;  %v1885_v1 = vsel %vm696_vm2, 1.0, %v2700_v3 }
  0xe3   :  { %v1886_v7 = vsel %vm697_vm3, 1.0, %v2700_v3  ;;  %vm699_vm5 = vcmp.ge.f32.partialorder %v268_v59, 1.0  ;;  %v1887_v10 = vsel %vm698_vm4, 1.0, %v2700_v3 }
  0xe4   :  { %v1888_v23 = vsel %vm699_vm5, 1.0, %v2700_v3 }
  0xe5   :  { %v336_v60 = vpop.f32.mrb[2].mxu0 }
  0xe6   :  { %v337_v61 = vadd.f32 %v336_v60, %v3130_v44  ;;  %v407_v63 = vpop.f32.mrb[2].mxu1  ;;  %v338_v0 = vpop.f32.mrb[3].mxu0 }
  0xe7   :  { %v408_v2 = vadd.f32 %v407_v63, %v3130_v44  ;;  %v339_v5 = vadd.f32 %v338_v0, %v3130_v44  ;;  %v409_v6 = vpop.f32.mrb[3].mxu1 }
  0xe8   :  { %vm700_vm6 = vcmp.ge.f32.partialorder %v337_v61, 1.0  ;;  %v410_v8 = vadd.f32 %v409_v6, %v3130_v44 }
  0xe9   :  { %v1889_v9 = vsel %vm700_vm6, 1.0, %v2700_v3  ;;  %vm702_vm7 = vcmp.ge.f32.partialorder %v408_v2, 1.0  ;;  %vm701_vm8 = vcmp.ge.f32.partialorder %v339_v5, 1.0 }
  0xea   :  { %v744_v11 = vcombine.low %v1885_v1, %v1889_v9  ;;  %v745_v12 = vcombine.high %v1885_v1, %v1889_v9  ;;  %v1891_v13 = vsel %vm702_vm7, 1.0, %v2700_v3  ;;  %v1890_v14 = vsel %vm701_vm8, 1.0, %v2700_v3 }
  0xeb   :  { %v760_v15 = vcombine.low %v1887_v10, %v1891_v13  ;;  %v761_v16 = vcombine.high %v1887_v10, %v1891_v13  ;;  %v880_v17 = vcombine.low %v1886_v7, %v1890_v14  ;;  %v881_v18 = vcombine.high %v1886_v7, %v1890_v14 }
  0xec   :  { %v752_v19 = vrot.slane %v744_v11, %v3137_v62  ;;  %v759_v20 = vrot.slane %v745_v12, %v3137_v62  ;;  %vm703_vm9 = vcmp.ge.f32.partialorder %v410_v8, 1.0  ;;  %v478_v22 = vpop.f32.mrb[4].mxu0 }
  0xed   :  { %v768_v24 = vrot.slane %v760_v15, %v3137_v62  ;;  %v775_v25 = vrot.slane %v761_v16, %v3137_v62  ;;  %v888_v26 = vrot.slane %v880_v17, %v3137_v62  ;;  %v549_v27 = vpop.f32.mrb[4].mxu1  ;;  %v480_v28 = vpop.f32.mrb[5].mxu0  ;;  %v1892_v30 = vsel %vm703_vm9, 1.0, %v2700_v3 }
  0xee   :  { %v479_v31 = vadd.f32 %v478_v22, %v3130_v44  ;;  %v550_v32 = vadd.f32 %v549_v27, %v3130_v44  ;;  %v481_v33 = vadd.f32 %v480_v28, %v3130_v44  ;;  %v551_v34 = vpop.f32.mrb[5].mxu1  ;;  %v895_v42 = vrot.slane %v881_v18, %v3137_v62 }
  0xef   :  { %v808_v38 = vcombine.low %v752_v19, %v768_v24  ;;  %v809_v39 = vcombine.high %v752_v19, %v768_v24  ;;  %v824_v40 = vcombine.low %v759_v20, %v775_v25  ;;  %v825_v41 = vcombine.high %v759_v20, %v775_v25 }
  0xf0   :  { %v896_v43 = vcombine.low %v1888_v23, %v1892_v30  ;;  %v897_v45 = vcombine.high %v1888_v23, %v1892_v30  ;;  %vm704_vm10 = vcmp.ge.f32.partialorder %v479_v31, 1.0  ;;  %vm706_vm11 = vcmp.ge.f32.partialorder %v550_v32, 1.0 }
  0xf1   :  { %v3183_v46 = vrot.slane %v824_v40, %v3150_v21  ;;  %v3186_v47 = vrot.slane %v825_v41, %v3150_v21  ;;  %v3193_v50 = vrot.slane %v808_v38, %v3150_v21  ;;  %v3198_v53 = vrot.slane %v809_v39, %v3150_v21 }
  0xf2   :  { %v904_v51 = vrot.slane %v896_v43, %v3137_v62  ;;  %v911_v52 = vrot.slane %v897_v45, %v3137_v62  ;;  %v1893_v54 = vsel %vm704_vm10, 1.0, %v2700_v3  ;;  %vm705_vm12 = vcmp.ge.f32.partialorder %v481_v33, 1.0 }
  0xf3   :  { %v552_v55 = vadd.f32 %v551_v34, %v3130_v44  ;;  %v620_v56 = vpop.f32.mrb[6].mxu0  ;;  %v1895_v0 = vsel %vm706_vm11, 1.0, %v2700_v3  ;;  %v1894_v5 = vsel %vm705_vm12, 1.0, %v2700_v3 }
  0xf4   :  { %v944_v57 = vcombine.low %v888_v26, %v904_v51  ;;  %v945_v58 = vcombine.high %v888_v26, %v904_v51  ;;  %v960_v59 = vcombine.low %v895_v42, %v911_v52  ;;  %v961_v60 = vcombine.high %v895_v42, %v911_v52  ;;  %v691_v61 = vpop.f32.mrb[6].mxu1  ;;  %v622_v63 = vpop.f32.mrb[7].mxu0 }
  0xf5   :  { %vm707_vm13 = vcmp.ge.f32.partialorder %v552_v55, 1.0  ;;  %v621_v1 = vadd.f32 %v620_v56, %v3130_v44  ;;  %v692_v2 = vadd.f32 %v691_v61, %v3130_v44  ;;  %v693_v4 = vpop.f32.mrb[7].mxu1  ;;  %v623_v7 = vadd.f32 %v622_v63, %v3130_v44  ;;  %v1951_v61 = vld [vmem:[%s3875_s3 + $0x290] sm:$0xff] }
  0xf6   :  { %v1896_v6 = vsel %vm707_vm13, 1.0, %v2700_v3  ;;  %v694_v8 = vadd.f32 %v693_v4, %v3130_v44  ;;  %v3210_v9 = vrot.slane %v944_v57, %v3150_v21  ;;  %v3213_v10 = vrot.slane %v945_v58, %v3150_v21 }
  0xf7   :  { %vm708_vm14 = vcmp.ge.f32.partialorder %v621_v1, 1.0  ;;  %vm710_vm15 = vcmp.ge.f32.partialorder %v692_v2, 1.0  ;;  %vm709_vm0 = vcmp.ge.f32.partialorder %v623_v7, 1.0  ;;  %v3220_v18 = vrot.slane %v960_v59, %v3150_v21  ;;  %v1983_v1 = vld [vmem:[%s3875_s3 + $0x390] sm:$0xff]  ;;  %v1984_v2 = vld [vmem:[%s3875_s3 + $0x398] sm:$0xff] }
  0xf8   :  { %v1897_v11 = vsel %vm708_vm14, 1.0, %v2700_v3  ;;  %v1899_v12 = vsel %vm710_vm15, 1.0, %v2700_v3  ;;  %vm711_vm1 = vcmp.ge.f32.partialorder %v694_v8, 1.0  ;;  %v1898_v44 = vsel %vm709_vm0, 1.0, %v2700_v3 }
  0xf9   :  { %v776_v13 = vcombine.low %v1893_v54, %v1897_v11  ;;  %v777_v14 = vcombine.high %v1893_v54, %v1897_v11  ;;  %v792_v15 = vcombine.low %v1895_v0, %v1899_v12  ;;  %v793_v16 = vcombine.high %v1895_v0, %v1899_v12  ;;  %v1952_v0 = vld [vmem:[%s3875_s3 + $0x298] sm:$0xff] }
  0xfa   :  { %v1900_v17 = vsel %vm711_vm1, 1.0, %v2700_v3  ;;  %v3223_v19 = vrot.slane %v961_v60, %v3150_v21  ;;  %v912_v25 = vcombine.low %v1894_v5, %v1898_v44  ;;  %v913_v26 = vcombine.high %v1894_v5, %v1898_v44 }
  0xfb   :  { %v784_v20 = vrot.slane %v776_v13, %v3137_v62  ;;  %v791_v22 = vrot.slane %v777_v14, %v3137_v62  ;;  %v800_v23 = vrot.slane %v792_v15, %v3137_v62  ;;  %v807_v24 = vrot.slane %v793_v16, %v3137_v62  ;;  %v1935_v14 = vld [vmem:[%s3875_s3 + $0x210] sm:$0xff] }
  0xfc   :  { %v928_v27 = vcombine.low %v1896_v6, %v1900_v17  ;;  %v929_v28 = vcombine.high %v1896_v6, %v1900_v17  ;;  %v920_v34 = vrot.slane %v912_v25, %v3137_v62  ;;  %v927_v38 = vrot.slane %v913_v26, %v3137_v62  ;;  %v1967_v15 = vld [vmem:[%s3875_s3 + $0x310] sm:$0xff]  ;;  %v1985_v25 = vld [vmem:[%s3875_s3 + $0x3a0] sm:$0xff]  ;;  %v1986_v26 = vld [vmem:[%s3875_s3 + $0x3a8] sm:$0xff] }
  0xfd   :  { %v840_v30 = vcombine.low %v784_v20, %v800_v23  ;;  %v841_v31 = vcombine.high %v784_v20, %v800_v23  ;;  %v856_v32 = vcombine.low %v791_v22, %v807_v24  ;;  %v857_v33 = vcombine.high %v791_v22, %v807_v24  ;;  %v1954_v24 = vld [vmem:[%s3875_s3 + $0x2a8] sm:$0xff] }
  0xfe   :  { %v936_v39 = vrot.slane %v928_v27, %v3137_v62  ;;  %v943_v40 = vrot.slane %v929_v28, %v3137_v62  ;;  %v2507_v22 = vpack.c.bf16 %v1952_v0, %v1951_v61  ;;  %v2539_v23 = vpack.c.bf16 %v1984_v2, %v1983_v1  ;;  %v1941_v0 = vld [vmem:[%s3875_s3 + $0x240] sm:$0xff]  ;;  %v1942_v1 = vld [vmem:[%s3875_s3 + $0x248] sm:$0xff] }
  0xff   :  { %v848_v41 = vrot.slane %v840_v30, %v3150_v21  ;;  %v3235_v42 = vrot.slane %v841_v31, %v3150_v21  ;;  %v3238_v43 = vrot.slane %v856_v32, %v3150_v21  ;;  %v3241_v45 = vrot.slane %v857_v33, %v3150_v21  ;;  %v1937_v30 = vld [vmem:[%s3875_s3 + $0x220] sm:$0xff]  ;;  %v1938_v31 = vld [vmem:[%s3875_s3 + $0x228] sm:$0xff] }
 0x100   :  { %v976_v51 = vcombine.low %v920_v34, %v936_v39  ;;  %v977_v52 = vcombine.high %v920_v34, %v936_v39  ;;  %v992_v54 = vcombine.low %v927_v38, %v943_v40  ;;  %v993_v55 = vcombine.high %v927_v38, %v943_v40  ;;  %v1939_v39 = vld [vmem:[%s3875_s3 + $0x230] sm:$0xff]  ;;  %v1940_v40 = vld [vmem:[%s3875_s3 + $0x238] sm:$0xff] }
 0x101   :  { %v873_v56 = vcombine.high %v3193_v50, %v848_v41  ;;  %v872_v57 = vcombine.low %v3193_v50, %v848_v41  ;;  %v874_v62 = vcombine.low %v3198_v53, %v3235_v42  ;;  %v875_v58 = vcombine.high %v3198_v53, %v3235_v42 }
 0x102   :  { %v984_v59 = vrot.slane %v976_v51, %v3150_v21  ;;  %v991_v60 = vrot.slane %v977_v52, %v3150_v21  ;;  %v3255_v63 = vrot.slane %v992_v54, %v3150_v21  ;;  %v876_v50 = vcombine.low %v3183_v46, %v3238_v43  ;;  %v1971_v52 = vld [vmem:[%s3875_s3 + $0x330] sm:$0xff]  ;;  %v1972_v54 = vld [vmem:[%s3875_s3 + $0x338] sm:$0xff] }
 0x103   :  { %v877_v4 = vcombine.high %v3183_v46, %v3238_v43  ;;  %v3271_v5 = vrot.slane %v993_v55, %v3150_v21  ;;  %v878_v6 = vcombine.low %v3186_v47, %v3241_v45  ;;  %v879_v7 = vcombine.high %v3186_v47, %v3241_v45  ;;  %v1936_v21 = vld [vmem:[%s3875_s3 + $0x218] sm:$0xff]  ;;  %v1957_v55 = vld [vmem:[%s3875_s3 + $0x2c0] sm:$0xff] }
 0x104   :  { %v1009_v8 = vcombine.high %v3210_v9, %v984_v59  ;;  %v1008_v11 = vcombine.low %v3210_v9, %v984_v59  ;;  %v1010_v12 = vcombine.low %v3213_v10, %v991_v60  ;;  %v1011_v13 = vcombine.high %v3213_v10, %v991_v60  ;;  %v1968_v9 = vld [vmem:[%s3875_s3 + $0x318] sm:$0xff]  ;;  %v1953_v10 = vld [vmem:[%s3875_s3 + $0x2a0] sm:$0xff]  ;;  %v1990_v59 = vld [vmem:[%s3875_s3 + $0x3c8] sm:$0xff] }
 0x105   :  { %v1012_v16 = vcombine.low %v3220_v18, %v3255_v63  ;;  %v1013_v44 = vcombine.high %v3220_v18, %v3255_v63  ;;  %v1014_v17 = vcombine.low %v3223_v19, %v3271_v5  ;;  %v1015_v20 = vcombine.high %v3223_v19, %v3271_v5  ;;  %v2034_v18 = vld [vmem:[%s3875_s3 + $0x528] sm:$0xff]  ;;  %v2019_v63 = vld [vmem:[%s3875_s3 + $0x4b0] sm:$0xff]  ;;  %v2097_v46 = vld [vmem:[%s3875_s3 + $0x720] sm:$0xff] }
 0x106   :  { %1145 = vmatprep.mubr.f32.mxu0 %v1009_v8  ;;  %1215 = vmatprep.mubr.f32.mxu1 %v1008_v11  ;;  %v2509_v27 = vpack.c.bf16 %v1936_v21, %v1935_v14  ;;  %v2541_v28 = vpack.c.bf16 %v1968_v9, %v1967_v15  ;;  %v2511_v32 = vpack.c.bf16 %v1954_v24, %v1953_v10  ;;  %v1973_v11 = vld [vmem:[%s3875_s3 + $0x340] sm:$0xff]  ;;  %v1960_v14 = vld [vmem:[%s3875_s3 + $0x2d8] sm:$0xff]  ;;  %v1991_v21 = vld [vmem:[%s3875_s3 + $0x3d0] sm:$0xff] }
 0x107   :  { %1146 = vmatmul.mubr.f32.vlgmr.msra.gmra.mrb[8].mxu0 %v873_v56  ;;  %1216 = vmatmul.mubr.f32.vlgmr.msra.gmra.mrb[8].mxu1 %v872_v57  ;;  %v2543_v33 = vpack.c.bf16 %v1986_v26, %v1985_v25  ;;  %v2513_v34 = vpack.c.bf16 %v1938_v31, %v1937_v30  ;;  %v2545_v38 = vpack.c.bf16 %v1970_v35, %v1969_v29  ;;  %v1958_v56 = vld [vmem:[%s3875_s3 + $0x2c8] sm:$0xff]  ;;  %v1989_v57 = vld [vmem:[%s3875_s3 + $0x3c0] sm:$0xff]  ;;  %v1992_v15 = vld [vmem:[%s3875_s3 + $0x3d8] sm:$0xff] }
 0x108   :  { %2506 = vmatpush3.bf16.msra.mxu0 %v2505_v48  ;;  %2538 = vmatpush3.bf16.msra.mxu1 %v2537_v49  ;;  %v1987_v48 = vld [vmem:[%s3875_s3 + $0x3b0] sm:$0xff]  ;;  %v1988_v49 = vld [vmem:[%s3875_s3 + $0x3b8] sm:$0xff]  ;;  %v2515_v41 = vpack.c.bf16 %v1956_v37, %v1955_v36  ;;  %v2517_v60 = vpack.c.bf16 %v1940_v40, %v1939_v39  ;;  %v2549_v61 = vpack.c.bf16 %v1972_v54, %v1971_v52  ;;  %v1962_v30 = vld [vmem:[%s3875_s3 + $0x2e8] sm:$0xff] }
 0x109   :  { %1318 = vmatprep.mubr.f32.mxu0 %v1010_v12  ;;  %1422 = vmatprep.mubr.f32.mxu1 %v1011_v13  ;;  %v2547_v51 = vpack.c.bf16 %v1988_v49, %v1987_v48  ;;  %v2519_v2 = vpack.c.bf16 %v1958_v56, %v1957_v55  ;;  %v2551_v8 = vpack.c.bf16 %v1990_v59, %v1989_v57  ;;  %v1974_v12 = vld [vmem:[%s3875_s3 + $0x348] sm:$0xff]  ;;  %v1959_v13 = vld [vmem:[%s3875_s3 + $0x2d0] sm:$0xff]  ;;  %v1993_v31 = vld [vmem:[%s3875_s3 + $0x3e0] sm:$0xff] }
 0x10a   :  { %2508 = vmatprep.subr.bf16.mxu0 %v2507_v22  ;;  %2540 = vmatprep.subr.bf16.mxu1 %v2539_v23  ;;  %v2521_v9 = vpack.c.bf16 %v1942_v1, %v1941_v0  ;;  %v2553_v10 = vpack.c.bf16 %v1974_v12, %v1973_v11  ;;  %v1943_v22 = vld [vmem:[%s3875_s3 + $0x250] sm:$0xff]  ;;  %v1944_v23 = vld [vmem:[%s3875_s3 + $0x258] sm:$0xff]  ;;  %v2523_v24 = vpack.c.bf16 %v1960_v14, %v1959_v13  ;;  %v1945_v35 = vld [vmem:[%s3875_s3 + $0x260] sm:$0xff] }
 0x10b   :  { %v2555_v25 = vpack.c.bf16 %v1992_v15, %v1991_v21  ;;  %v1975_v26 = vld [vmem:[%s3875_s3 + $0x350] sm:$0xff]  ;;  %v1946_v36 = vld [vmem:[%s3875_s3 + $0x268] sm:$0xff]  ;;  %v1977_v49 = vld [vmem:[%s3875_s3 + $0x360] sm:$0xff] }
 0x10c   :  { %2510 = vmatpush3.bf16.msra.mxu0 %v2509_v27  ;;  %2542 = vmatpush3.bf16.msra.mxu1 %v2541_v28  ;;  %v1976_v27 = vld [vmem:[%s3875_s3 + $0x358] sm:$0xff]  ;;  %v1961_v28 = vld [vmem:[%s3875_s3 + $0x2e0] sm:$0xff]  ;;  %v1995_v40 = vld [vmem:[%s3875_s3 + $0x3f0] sm:$0xff] }
 0x10d   :  { %2512 = vmatprep.subr.bf16.mxu0 %v2511_v32  ;;  %2544 = vmatprep.subr.bf16.mxu1 %v2543_v33  ;;  %v1994_v32 = vld [vmem:[%s3875_s3 + $0x3e8] sm:$0xff]  ;;  %v2525_v33 = vpack.c.bf16 %v1944_v23, %v1943_v22  ;;  %v2557_v29 = vpack.c.bf16 %v1976_v27, %v1975_v26  ;;  %v2527_v37 = vpack.c.bf16 %v1962_v30, %v1961_v28  ;;  %v1964_v39 = vld [vmem:[%s3875_s3 + $0x2f8] sm:$0xff]  ;;  %v1947_v54 = vld [vmem:[%s3875_s3 + $0x270] sm:$0xff] }
 0x10e   :  { %v2559_v48 = vpack.c.bf16 %v1994_v32, %v1993_v31  ;;  %v1948_v55 = vld [vmem:[%s3875_s3 + $0x278] sm:$0xff]  ;;  %v1979_v59 = vld [vmem:[%s3875_s3 + $0x370] sm:$0xff]  ;;  %v2014_v0 = vld [vmem:[%s3875_s3 + $0x488] sm:$0xff] }
 0x10f   :  { %v2045_v1 = vld [vmem:[%s3875_s3 + $0x580] sm:$0xff]  ;;  %v1998_v21 = vld [vmem:[%s3875_s3 + $0x408] sm:$0xff]  ;;  %v2016_v22 = vld [vmem:[%s3875_s3 + $0x498] sm:$0xff] }
 0x110   :  { %2514 = vmatpush3.bf16.msra.mxu0 %v2513_v34  ;;  %2546 = vmatpush3.bf16.msra.mxu1 %v2545_v38  ;;  %v1978_v34 = vld [vmem:[%s3875_s3 + $0x368] sm:$0xff]  ;;  %v1963_v38 = vld [vmem:[%s3875_s3 + $0x2f0] sm:$0xff]  ;;  %v1997_v14 = vld [vmem:[%s3875_s3 + $0x400] sm:$0xff] }
 0x111   :  { %2516 = vmatprep.subr.bf16.mxu0 %v2515_v41  ;;  %2548 = vmatprep.subr.bf16.mxu1 %v2547_v51  ;;  %v1996_v41 = vld [vmem:[%s3875_s3 + $0x3f8] sm:$0xff]  ;;  %v2529_v51 = vpack.c.bf16 %v1946_v36, %v1945_v35  ;;  %v2561_v52 = vpack.c.bf16 %v1978_v34, %v1977_v49  ;;  %v2531_v56 = vpack.c.bf16 %v1964_v39, %v1963_v38  ;;  %v2029_v15 = vld [vmem:[%s3875_s3 + $0x500] sm:$0xff]  ;;  %v2047_v23 = vld [vmem:[%s3875_s3 + $0x590] sm:$0xff] }
 0x112   :  { %v2563_v57 = vpack.c.bf16 %v1996_v41, %v1995_v40  ;;  %v1999_v27 = vld [vmem:[%s3875_s3 + $0x410] sm:$0xff]  ;;  %v2000_v28 = vld [vmem:[%s3875_s3 + $0x418] sm:$0xff]  ;;  %v2018_v35 = vld [vmem:[%s3875_s3 + $0x4a8] sm:$0xff] }
 0x113   :  { %v2031_v30 = vld [vmem:[%s3875_s3 + $0x510] sm:$0xff]  ;;  %v2049_v36 = vld [vmem:[%s3875_s3 + $0x5a0] sm:$0xff]  ;;  %v2052_v38 = vld [vmem:[%s3875_s3 + $0x5b8] sm:$0xff] }
 0x114   :  { %2518 = vmatpush3.bf16.msra.mxu0 %v2517_v60  ;;  %2550 = vmatpush3.bf16.msra.mxu1 %v2549_v61  ;;  %v1980_v60 = vld [vmem:[%s3875_s3 + $0x378] sm:$0xff]  ;;  %v2013_v61 = vld [vmem:[%s3875_s3 + $0x480] sm:$0xff]  ;;  %v2051_v34 = vld [vmem:[%s3875_s3 + $0x5b0] sm:$0xff] }
 0x115   :  { %2520 = vmatprep.subr.bf16.mxu0 %v2519_v2  ;;  %2552 = vmatprep.subr.bf16.mxu1 %v2551_v8  ;;  %v2046_v2 = vld [vmem:[%s3875_s3 + $0x588] sm:$0xff]  ;;  %v2533_v8 = vpack.c.bf16 %v1948_v55, %v1947_v54  ;;  %v2565_v11 = vpack.c.bf16 %v1980_v60, %v1979_v59  ;;  %v2567_v12 = vpack.c.bf16 %v2014_v0, %v2013_v61  ;;  %v2035_v54 = vld [vmem:[%s3875_s3 + $0x530] sm:$0xff]  ;;  %v2053_v60 = vld [vmem:[%s3875_s3 + $0x5c0] sm:$0xff] }
 0x116   :  { %v2599_v13 = vpack.c.bf16 %v2046_v2, %v2045_v1  ;;  %v2611_v55 = vpack.c.bf16 %v2052_v38, %v2051_v34  ;;  %v2022_v59 = vld [vmem:[%s3875_s3 + $0x4c8] sm:$0xff]  ;;  %v2115_v19 = vld [vmem:[%s3875_s3 + $0x7b0] sm:$0xff]  ;;  %v2116_v5 = vld [vmem:[%s3875_s3 + $0x7b8] sm:$0xff] }
 0x117   :  { %v2054_v61 = vld [vmem:[%s3875_s3 + $0x5c8] sm:$0xff] }
 0x118   :  { %2522 = vmatpush3.bf16.msra.mxu0 %v2521_v9  ;;  %2554 = vmatpush3.bf16.msra.mxu1 %v2553_v10  ;;  %v2030_v9 = vld [vmem:[%s3875_s3 + $0x508] sm:$0xff]  ;;  %v2015_v10 = vld [vmem:[%s3875_s3 + $0x490] sm:$0xff] }
 0x119   :  { %2524 = vmatprep.subr.bf16.mxu0 %v2523_v24  ;;  %2556 = vmatprep.subr.bf16.mxu1 %v2555_v25  ;;  %v2048_v24 = vld [vmem:[%s3875_s3 + $0x598] sm:$0xff]  ;;  %v2569_v25 = vpack.c.bf16 %v1998_v21, %v1997_v14  ;;  %v2601_v26 = vpack.c.bf16 %v2030_v9, %v2029_v15  ;;  %v2571_v31 = vpack.c.bf16 %v2016_v22, %v2015_v10  ;;  %v2038_v14 = vld [vmem:[%s3875_s3 + $0x548] sm:$0xff]  ;;  %v2023_v21 = vld [vmem:[%s3875_s3 + $0x4d0] sm:$0xff] }
 0x11a   :  { %v2603_v32 = vpack.c.bf16 %v2048_v24, %v2047_v23  ;;  %v2024_v15 = vld [vmem:[%s3875_s3 + $0x4d8] sm:$0xff]  ;;  %v2055_v9 = vld [vmem:[%s3875_s3 + $0x5d0] sm:$0xff] }
 0x11b   :  { %v2056_v10 = vld [vmem:[%s3875_s3 + $0x5d8] sm:$0xff]  ;;  %v2587_v24 = vpack.c.bf16 %v2024_v15, %v2023_v21  ;;  %v2111_v21 = vld [vmem:[%s3875_s3 + $0x790] sm:$0xff] }
 0x11c   :  { %2526 = vmatpush3.bf16.msra.mxu0 %v2525_v33  ;;  %2558 = vmatpush3.bf16.msra.mxu1 %v2557_v29  ;;  %v2032_v33 = vld [vmem:[%s3875_s3 + $0x518] sm:$0xff]  ;;  %v2017_v29 = vld [vmem:[%s3875_s3 + $0x4a0] sm:$0xff] }
 0x11d   :  { %2528 = vmatprep.subr.bf16.mxu0 %v2527_v37  ;;  %2560 = vmatprep.subr.bf16.mxu1 %v2559_v48  ;;  %v2050_v37 = vld [vmem:[%s3875_s3 + $0x5a8] sm:$0xff]  ;;  %v2573_v48 = vpack.c.bf16 %v2000_v28, %v1999_v27  ;;  %v2605_v53 = vpack.c.bf16 %v2032_v33, %v2031_v30  ;;  %v2575_v42 = vpack.c.bf16 %v2018_v35, %v2017_v29  ;;  %v2039_v27 = vld [vmem:[%s3875_s3 + $0x550] sm:$0xff]  ;;  %v2040_v30 = vld [vmem:[%s3875_s3 + $0x558] sm:$0xff] }
 0x11e   :  { %v2607_v49 = vpack.c.bf16 %v2050_v37, %v2049_v36  ;;  %v2619_v28 = vpack.c.bf16 %v2056_v10, %v2055_v9  ;;  %v2057_v33 = vld [vmem:[%s3875_s3 + $0x5e0] sm:$0xff]  ;;  %v2058_v29 = vld [vmem:[%s3875_s3 + $0x5e8] sm:$0xff]  ;;  %v2621_v36 = vpack.c.bf16 %v2040_v30, %v2039_v27  ;;  %v2112_v15 = vld [vmem:[%s3875_s3 + $0x798] sm:$0xff] }
 0x11f   :  { %v2063_v10 = vld [vmem:[%s3875_s3 + $0x610] sm:$0xff]  ;;  %v2082_v27 = vld [vmem:[%s3875_s3 + $0x6a8] sm:$0xff]  ;;  %v2113_v30 = vld [vmem:[%s3875_s3 + $0x7a0] sm:$0xff] }
 0x120   :  { %2530 = vmatpush3.bf16.msra.mxu0 %v2529_v51  ;;  %2562 = vmatpush3.bf16.msra.mxu1 %v2561_v52  ;;  %v2003_v51 = vld [vmem:[%s3875_s3 + $0x430] sm:$0xff]  ;;  %v2004_v52 = vld [vmem:[%s3875_s3 + $0x438] sm:$0xff] }
 0x121   :  { %2532 = vmatprep.subr.bf16.mxu0 %v2531_v56  ;;  %2564 = vmatprep.subr.bf16.mxu1 %v2563_v57  ;;  %v2036_v56 = vld [vmem:[%s3875_s3 + $0x538] sm:$0xff]  ;;  %v2021_v57 = vld [vmem:[%s3875_s3 + $0x4c0] sm:$0xff]  ;;  %v2581_v0 = vpack.c.bf16 %v2004_v52, %v2003_v51 }
 0x122   :  { %v2613_v1 = vpack.c.bf16 %v2036_v56, %v2035_v54  ;;  %v2583_v2 = vpack.c.bf16 %v2022_v59, %v2021_v57  ;;  %v2044_v52 = vld [vmem:[%s3875_s3 + $0x578] sm:$0xff]  ;;  %v2077_v54 = vld [vmem:[%s3875_s3 + $0x680] sm:$0xff]  ;;  %v2110_v57 = vld [vmem:[%s3875_s3 + $0x788] sm:$0xff] }
 0x123   :  { %v2109_v56 = vld [vmem:[%s3875_s3 + $0x780] sm:$0xff] }
 0x124   :  { %2534 = vmatpush3.bf16.msra.mxu0 %v2533_v8  ;;  %2566 = vmatpush3.bf16.msra.mxu1 %v2565_v11  ;;  %v2005_v8 = vld [vmem:[%s3875_s3 + $0x440] sm:$0xff]  ;;  %v2006_v11 = vld [vmem:[%s3875_s3 + $0x448] sm:$0xff] }
 0x125   :  { %2568 = vmatprep.subr.bf16.mxu0 %v2567_v12  ;;  %2600 = vmatprep.subr.bf16.mxu1 %v2599_v13  ;;  %v2037_v12 = vld [vmem:[%s3875_s3 + $0x540] sm:$0xff]  ;;  %v2615_v13 = vpack.c.bf16 %v2054_v61, %v2053_v60  ;;  %v2585_v22 = vpack.c.bf16 %v2006_v11, %v2005_v8  ;;  %v2094_v11 = vld [vmem:[%s3875_s3 + $0x708] sm:$0xff] }
 0x126   :  { %v2617_v23 = vpack.c.bf16 %v2038_v14, %v2037_v12  ;;  %v2093_v8 = vld [vmem:[%s3875_s3 + $0x700] sm:$0xff]  ;;  %v2079_v12 = vld [vmem:[%s3875_s3 + $0x690] sm:$0xff] }
 0x127   :  { %1319 = vmatmul.mubr.f32.vlgmr.msra.gmra.mrb[10].mxu0 %v874_v62  ;;  %1423 = vmatmul.mubr.f32.vlgmr.msra.gmra.mrb[10].mxu1 %v875_v58  ;;  %v2001_v62 = vld [vmem:[%s3875_s3 + $0x420] sm:$0xff]  ;;  %v2002_v58 = vld [vmem:[%s3875_s3 + $0x428] sm:$0xff]  ;;  %v2665_v9 = vpack.c.bf16 %v2094_v11, %v2093_v8  ;;  %v2103_v8 = vld [vmem:[%s3875_s3 + $0x750] sm:$0xff] }
 0x128   :  { %2570 = vmatpush3.bf16.msra.mxu0 %v2569_v25  ;;  %1526 = vmatprep.mubr.f32.mxu0 %v1012_v16  ;;  %v2033_v16 = vld [vmem:[%s3875_s3 + $0x520] sm:$0xff]  ;;  %v2577_v39 = vpack.c.bf16 %v2002_v58, %v2001_v62  ;;  %v2007_v25 = vld [vmem:[%s3875_s3 + $0x450] sm:$0xff]  ;;  %v2623_v62 = vpack.c.bf16 %v2058_v29, %v2057_v33  ;;  %v2042_v58 = vld [vmem:[%s3875_s3 + $0x568] sm:$0xff] }
 0x129   :  { %2602 = vmatpush3.bf16.msra.mxu1 %v2601_v26  ;;  %1630 = vmatprep.mubr.f32.mxu1 %v1013_v44  ;;  %v2020_v44 = vld [vmem:[%s3875_s3 + $0x4b8] sm:$0xff]  ;;  %v2609_v40 = vpack.c.bf16 %v2034_v18, %v2033_v16  ;;  %v2027_v16 = vld [vmem:[%s3875_s3 + $0x4f0] sm:$0xff]  ;;  %v2065_v29 = vld [vmem:[%s3875_s3 + $0x620] sm:$0xff] }
 0x12a   :  { %2572 = vmatprep.subr.bf16.mxu0 %v2571_v31  ;;  %2604 = vmatprep.subr.bf16.mxu1 %v2603_v32  ;;  %v2579_v41 = vpack.c.bf16 %v2020_v44, %v2019_v63  ;;  %v2008_v26 = vld [vmem:[%s3875_s3 + $0x458] sm:$0xff]  ;;  %v2025_v31 = vld [vmem:[%s3875_s3 + $0x4e0] sm:$0xff]  ;;  %v2026_v32 = vld [vmem:[%s3875_s3 + $0x4e8] sm:$0xff] }
 0x12b   :  { %v2589_v35 = vpack.c.bf16 %v2008_v26, %v2007_v25  ;;  %v2591_v37 = vpack.c.bf16 %v2026_v32, %v2025_v31  ;;  %v2059_v18 = vld [vmem:[%s3875_s3 + $0x5f0] sm:$0xff]  ;;  %v2060_v63 = vld [vmem:[%s3875_s3 + $0x5f8] sm:$0xff]  ;;  %v2081_v26 = vld [vmem:[%s3875_s3 + $0x6a0] sm:$0xff] }
 0x12c   :  { %2574 = vmatpush3.bf16.msra.mxu0 %v2573_v48  ;;  %v2009_v48 = vld [vmem:[%s3875_s3 + $0x460] sm:$0xff]  ;;  %v2627_v51 = vpack.c.bf16 %v2060_v63, %v2059_v18  ;;  %v2096_v25 = vld [vmem:[%s3875_s3 + $0x718] sm:$0xff]  ;;  %v2114_v31 = vld [vmem:[%s3875_s3 + $0x7a8] sm:$0xff]  ;;  %v2639_v33 = vpack.c.bf16 %v2082_v27, %v2081_v26 }
 0x12d   :  { %2606 = vmatpush3.bf16.msra.mxu1 %v2605_v53  ;;  %2576 = vmatprep.subr.bf16.mxu0 %v2575_v42  ;;  %v2010_v53 = vld [vmem:[%s3875_s3 + $0x468] sm:$0xff]  ;;  %v2041_v42 = vld [vmem:[%s3875_s3 + $0x560] sm:$0xff]  ;;  %v2671_v43 = vpack.c.bf16 %v2114_v31, %v2113_v30  ;;  %v2092_v30 = vld [vmem:[%s3875_s3 + $0x6f8] sm:$0xff] }
 0x12e   :  { %2608 = vmatprep.subr.bf16.mxu1 %v2607_v49  ;;  %v2028_v49 = vld [vmem:[%s3875_s3 + $0x4f8] sm:$0xff]  ;;  %v2593_v44 = vpack.c.bf16 %v2010_v53, %v2009_v48  ;;  %v2625_v34 = vpack.c.bf16 %v2042_v58, %v2041_v42  ;;  %v2067_v53 = vld [vmem:[%s3875_s3 + $0x630] sm:$0xff]  ;;  %v2675_v58 = vpack.c.bf16 %v2116_v5, %v2115_v19  ;;  %v2086_v18 = vld [vmem:[%s3875_s3 + $0x6c8] sm:$0xff] }
 0x12f   :  { %v2595_v38 = vpack.c.bf16 %v2028_v49, %v2027_v16  ;;  %v2068_v42 = vld [vmem:[%s3875_s3 + $0x638] sm:$0xff]  ;;  %v2085_v49 = vld [vmem:[%s3875_s3 + $0x6c0] sm:$0xff]  ;;  %v2106_v27 = vld [vmem:[%s3875_s3 + $0x768] sm:$0xff] }
 0x130   :  { %2578 = vmatpush3.bf16.msra.mxu0 %v2577_v39  ;;  %v2011_v39 = vld [vmem:[%s3875_s3 + $0x470] sm:$0xff]  ;;  %v2100_v16 = vld [vmem:[%s3875_s3 + $0x738] sm:$0xff]  ;;  %v2117_v63 = vld [vmem:[%s3875_s3 + $0x7c0] sm:$0xff] }
 0x131   :  { %2610 = vmatpush3.bf16.msra.mxu1 %v2609_v40  ;;  %2580 = vmatprep.subr.bf16.mxu0 %v2579_v41  ;;  %v2012_v40 = vld [vmem:[%s3875_s3 + $0x478] sm:$0xff]  ;;  %v2043_v41 = vld [vmem:[%s3875_s3 + $0x570] sm:$0xff] }
 0x132   :  { %2612 = vmatprep.subr.bf16.mxu1 %v2611_v55  ;;  %v2078_v55 = vld [vmem:[%s3875_s3 + $0x688] sm:$0xff]  ;;  %v2597_v59 = vpack.c.bf16 %v2012_v40, %v2011_v39  ;;  %v2629_v60 = vpack.c.bf16 %v2044_v52, %v2043_v41  ;;  %v2647_v39 = vpack.c.bf16 %v2086_v18, %v2085_v49  ;;  %v2069_v40 = vld [vmem:[%s3875_s3 + $0x640] sm:$0xff]  ;;  %v2123_v31 = vld [vmem:[%s3875_s3 + $0x7f0] sm:$0xff] }
 0x133   :  { %v2631_v61 = vpack.c.bf16 %v2078_v55, %v2077_v54  ;;  %v2070_v41 = vld [vmem:[%s3875_s3 + $0x648] sm:$0xff]  ;;  %v2087_v55 = vld [vmem:[%s3875_s3 + $0x6d0] sm:$0xff] }
 0x134   :  { %2582 = vmatpush3.bf16.msra.mxu0 %v2581_v0  ;;  %v2061_v0 = vld [vmem:[%s3875_s3 + $0x600] sm:$0xff]  ;;  %v2102_v54 = vld [vmem:[%s3875_s3 + $0x748] sm:$0xff] }
 0x135   :  { %2614 = vmatpush3.bf16.msra.mxu1 %v2613_v1  ;;  %2584 = vmatprep.subr.bf16.mxu0 %v2583_v2  ;;  %v2062_v1 = vld [vmem:[%s3875_s3 + $0x608] sm:$0xff]  ;;  %v2663_v2 = vpack.c.bf16 %v2110_v57, %v2109_v56  ;;  %v2088_v56 = vld [vmem:[%s3875_s3 + $0x6d8] sm:$0xff]  ;;  %v2119_v57 = vld [vmem:[%s3875_s3 + $0x7d0] sm:$0xff] }
 0x136   :  { %2616 = vmatprep.subr.bf16.mxu1 %v2615_v13  ;;  %v2080_v13 = vld [vmem:[%s3875_s3 + $0x698] sm:$0xff]  ;;  %v2633_v14 = vpack.c.bf16 %v2062_v1, %v2061_v0  ;;  %v2651_v0 = vpack.c.bf16 %v2088_v56, %v2087_v55  ;;  %v2071_v1 = vld [vmem:[%s3875_s3 + $0x650] sm:$0xff] }
 0x138   :  { %2586 = vmatpush3.bf16.msra.mxu0 %v2585_v22  ;;  %v2064_v22 = vld [vmem:[%s3875_s3 + $0x618] sm:$0xff] }
 0x139   :  { %2618 = vmatpush3.bf16.msra.mxu1 %v2617_v23  ;;  %2588 = vmatprep.subr.bf16.mxu0 %v2587_v24  ;;  %v2095_v23 = vld [vmem:[%s3875_s3 + $0x710] sm:$0xff]  ;;  %v2635_v24 = vpack.c.bf16 %v2080_v13, %v2079_v12  ;;  %v2637_v32 = vpack.c.bf16 %v2064_v22, %v2063_v10  ;;  %v2104_v12 = vld [vmem:[%s3875_s3 + $0x758] sm:$0xff]  ;;  %v2089_v13 = vld [vmem:[%s3875_s3 + $0x6e0] sm:$0xff] }
 0x13a   :  { %2620 = vmatprep.subr.bf16.mxu1 %v2619_v28  ;;  %v2667_v28 = vpack.c.bf16 %v2112_v15, %v2111_v21  ;;  %v2121_v21 = vld [vmem:[%s3875_s3 + $0x7e0] sm:$0xff]  ;;  %v2122_v15 = vld [vmem:[%s3875_s3 + $0x7e8] sm:$0xff]  ;;  %v2685_v10 = vpack.c.bf16 %v2104_v12, %v2103_v8 }
 0x13b   :  { %v2687_v26 = vpack.c.bf16 %v2122_v15, %v2121_v21 }
 0x13c   :  { %2590 = vmatpush3.bf16.msra.mxu0 %v2589_v35  ;;  %v2066_v35 = vld [vmem:[%s3875_s3 + $0x628] sm:$0xff] }
 0x13d   :  { %2622 = vmatpush3.bf16.msra.mxu1 %v2621_v36  ;;  %2592 = vmatprep.subr.bf16.mxu0 %v2591_v37  ;;  %v2084_v36 = vld [vmem:[%s3875_s3 + $0x6b8] sm:$0xff] }
 0x13e   :  { %2624 = vmatprep.subr.bf16.mxu1 %v2623_v62  ;;  %v2099_v62 = vld [vmem:[%s3875_s3 + $0x730] sm:$0xff] }
 0x140   :  { %2594 = vmatpush3.bf16.msra.mxu0 %v2593_v44  ;;  %v2118_v44 = vld [vmem:[%s3875_s3 + $0x7c8] sm:$0xff] }
 0x141   :  { %2626 = vmatpush3.bf16.msra.mxu1 %v2625_v34  ;;  %2596 = vmatprep.subr.bf16.mxu0 %v2595_v38  ;;  %v2645_v34 = vpack.c.bf16 %v2068_v42, %v2067_v53  ;;  %v2677_v38 = vpack.c.bf16 %v2100_v16, %v2099_v62  ;;  %v2679_v52 = vpack.c.bf16 %v2118_v44, %v2117_v63 }
 0x142   :  { %2628 = vmatprep.subr.bf16.mxu1 %v2627_v51  ;;  %v2101_v51 = vld [vmem:[%s3875_s3 + $0x740] sm:$0xff] }
 0x144   :  { %2598 = vmatpush3.bf16.msra.mxu0 %v2597_v59  ;;  %v2120_v59 = vld [vmem:[%s3875_s3 + $0x7d8] sm:$0xff] }
 0x145   :  { %2630 = vmatpush3.bf16.msra.mxu1 %v2629_v60  ;;  %2632 = vmatprep.subr.bf16.mxu0 %v2631_v61  ;;  %v2649_v60 = vpack.c.bf16 %v2070_v41, %v2069_v40  ;;  %v2681_v61 = vpack.c.bf16 %v2102_v54, %v2101_v51  ;;  %v2683_v11 = vpack.c.bf16 %v2120_v59, %v2119_v57 }
 0x146   :  { %2664 = vmatprep.subr.bf16.mxu1 %v2663_v2  ;;  %v2072_v2 = vld [vmem:[%s3875_s3 + $0x658] sm:$0xff] }
 0x147   :  { %1527 = vmatmul.mubr.f32.vlgmr.msra.gmra.mrb[12].mxu0 %v876_v50  ;;  %v2669_v50 = vpack.c.bf16 %v2096_v25, %v2095_v23  ;;  %v2073_v23 = vld [vmem:[%s3875_s3 + $0x660] sm:$0xff] }
 0x148   :  { %1631 = vmatmul.mubr.f32.vlgmr.msra.gmra.mrb[12].mxu1 %v877_v4  ;;  %2634 = vmatpush3.bf16.msra.mxu0 %v2633_v14  ;;  %v2098_v4 = vld [vmem:[%s3875_s3 + $0x728] sm:$0xff]  ;;  %v2105_v25 = vld [vmem:[%s3875_s3 + $0x760] sm:$0xff] }
 0x149   :  { %1734 = vmatprep.mubr.f32.mxu0 %v1014_v17  ;;  %2666 = vmatpush3.bf16.msra.mxu1 %v2665_v9  ;;  %v2083_v17 = vld [vmem:[%s3875_s3 + $0x6b0] sm:$0xff]  ;;  %v2673_v37 = vpack.c.bf16 %v2098_v4, %v2097_v46  ;;  %v2090_v14 = vld [vmem:[%s3875_s3 + $0x6e8] sm:$0xff]  ;;  %v2653_v9 = vpack.c.bf16 %v2072_v2, %v2071_v1  ;;  %v2076_v46 = vld [vmem:[%s3875_s3 + $0x678] sm:$0xff] }
 0x14a   :  { %1838 = vmatprep.mubr.f32.mxu1 %v1015_v20  ;;  %2636 = vmatprep.subr.bf16.mxu0 %v2635_v24  ;;  %v2641_v20 = vpack.c.bf16 %v2066_v35, %v2065_v29  ;;  %v2643_v48 = vpack.c.bf16 %v2084_v36, %v2083_v17  ;;  %v2655_v22 = vpack.c.bf16 %v2090_v14, %v2089_v13  ;;  %v2074_v24 = vld [vmem:[%s3875_s3 + $0x668] sm:$0xff]  ;;  %v2075_v35 = vld [vmem:[%s3875_s3 + $0x670] sm:$0xff]  ;;  %v2108_v17 = vld [vmem:[%s3875_s3 + $0x778] sm:$0xff] }
 0x14b   :  { %2668 = vmatprep.subr.bf16.mxu1 %v2667_v28  ;;  %v2091_v28 = vld [vmem:[%s3875_s3 + $0x6f0] sm:$0xff]  ;;  %v2661_v36 = vpack.c.bf16 %v2076_v46, %v2075_v35 }
 0x14c   :  { %2638 = vmatpush3.bf16.msra.mxu0 %v2637_v32  ;;  %v2124_v32 = vld [vmem:[%s3875_s3 + $0x7f8] sm:$0xff]  ;;  %v2659_v29 = vpack.c.bf16 %v2092_v30, %v2091_v28  ;;  %v2107_v4 = vld [vmem:[%s3875_s3 + $0x770] sm:$0xff] }
 0x14d   :  { %2670 = vmatpush3.bf16.msra.mxu1 %v2669_v50  ;;  %2640 = vmatprep.subr.bf16.mxu0 %v2639_v33  ;;  %v2657_v50 = vpack.c.bf16 %v2074_v24, %v2073_v23  ;;  %v2689_v33 = vpack.c.bf16 %v2106_v27, %v2105_v25  ;;  %v2693_v19 = vpack.c.bf16 %v2108_v17, %v2107_v4 }
 0x14e   :  { %2672 = vmatprep.subr.bf16.mxu1 %v2671_v43  ;;  %v2691_v43 = vpack.c.bf16 %v2124_v32, %v2123_v31 }
 0x150   :  { %2642 = vmatpush3.bf16.msra.mxu0 %v2641_v20 }
 0x151   :  { %2674 = vmatpush3.bf16.msra.mxu1 %v2673_v37  ;;  %2644 = vmatprep.subr.bf16.mxu0 %v2643_v48 }
 0x152   :  { %2676 = vmatprep.subr.bf16.mxu1 %v2675_v58 }
 0x154   :  { %2646 = vmatpush3.bf16.msra.mxu0 %v2645_v34 }
 0x155   :  { %2678 = vmatpush3.bf16.msra.mxu1 %v2677_v38  ;;  %2648 = vmatprep.subr.bf16.mxu0 %v2647_v39 }
 0x156   :  { %2680 = vmatprep.subr.bf16.mxu1 %v2679_v52 }
 0x158   :  { %2650 = vmatpush3.bf16.msra.mxu0 %v2649_v60 }
 0x159   :  { %2682 = vmatpush3.bf16.msra.mxu1 %v2681_v61  ;;  %2652 = vmatprep.subr.bf16.mxu0 %v2651_v0  ;;  %v2125_v61 = vld [vmem:[%s3876_s4] ss:$0 sm:$0xff] }
 0x15a   :  { %2684 = vmatprep.subr.bf16.mxu1 %v2683_v11 }
 0x15c   :  { %2654 = vmatpush3.bf16.msra.mxu0 %v2653_v9 }
 0x15d   :  { %2686 = vmatpush3.bf16.msra.mxu1 %v2685_v10  ;;  %2656 = vmatprep.subr.bf16.mxu0 %v2655_v22 }
 0x15e   :  { %2688 = vmatprep.subr.bf16.mxu1 %v2687_v26 }
 0x160   :  { %2658 = vmatpush3.bf16.msra.mxu0 %v2657_v50 }
 0x161   :  { %2690 = vmatpush3.bf16.msra.mxu1 %v2689_v33  ;;  %2660 = vmatprep.subr.bf16.mxu0 %v2659_v29 }
 0x162   :  { %2692 = vmatprep.subr.bf16.mxu1 %v2691_v43 }
 0x164   :  { %2662 = vmatpush3.bf16.msra.mxu0 %v2661_v36 }
 0x165   :  { %2694 = vmatpush3.bf16.msra.mxu1 %v2693_v19 }
 0x167   :  { %1735 = vmatmul.mubr.f32.vlgmr.msra.gmra.mrb[14].mxu0 %v878_v6 }
 0x168   :  { %1839 = vmatmul.mubr.f32.vlgmr.msra.gmra.mrb[14].mxu1 %v879_v7 }
 0x1da   :  { %v2159_v5 = vpop.f32.mrb[8].mxu0  ;;  %v2194_v20 = vpop.f32.mrb[8].mxu1 }
 0x1db   :  { %v2160_v37 = vpop.f32.mrb[9].mxu0  ;;  %v2195_v48 = vpop.f32.mrb[9].mxu1 }
 0x1dc   :  { %v2161_v53 = vadd.f32 %v2160_v37, %v2159_v5  ;;  %v2196_v42 = vadd.f32 %v2195_v48, %v2194_v20 }
 0x1de   :  { %v1218_v62 = vadd.f32 %v2196_v42, %v2161_v53 }
 0x1fa   :  { %v2229_v58 = vpop.f32.mrb[10].mxu0  ;;  %v2264_v16 = vpop.f32.mrb[10].mxu1 }
 0x1fb   :  { %v2230_v49 = vpop.f32.mrb[11].mxu0  ;;  %v2265_v18 = vpop.f32.mrb[11].mxu1 }
 0x1fc   :  { %v2231_v63 = vadd.f32 %v2230_v49, %v2229_v58  ;;  %v2266_v44 = vadd.f32 %v2265_v18, %v2264_v16 }
 0x1fe   :  { %v1324_v34 = vadd.f32 %v2231_v63, %v1218_v62 }
 0x200   :  { %v1428_v38 = vadd.f32 %v2266_v44, %v1324_v34 }
 0x21a   :  { %v2299_v6 = vpop.f32.mrb[12].mxu0 }
 0x21b   :  { %v2334_v39 = vpop.f32.mrb[12].mxu1  ;;  %v2300_v40 = vpop.f32.mrb[13].mxu0 }
 0x21c   :  { %v2301_v47 = vadd.f32 %v2300_v40, %v2299_v6  ;;  %v2335_v45 = vpop.f32.mrb[13].mxu1 }
 0x21d   :  { %v2336_v7 = vadd.f32 %v2335_v45, %v2334_v39 }
 0x21e   :  { %v1532_v41 = vadd.f32 %v2301_v47, %v1428_v38 }
 0x220   :  { %v1636_v51 = vadd.f32 %v2336_v7, %v1532_v41 }
 0x23a   :  { %v2369_v52 = vpop.f32.mrb[14].mxu0 }
 0x23b   :  { %v2404_v54 = vpop.f32.mrb[14].mxu1  ;;  %v2370_v55 = vpop.f32.mrb[15].mxu0 }
 0x23c   :  { %v2371_v56 = vadd.f32 %v2370_v55, %v2369_v52  ;;  %v2405_v57 = vpop.f32.mrb[15].mxu1 }
 0x23d   :  { %v2406_v59 = vadd.f32 %v2405_v57, %v2404_v54 }
 0x23e   :  { %v1740_v60 = vadd.f32 %v2371_v56, %v1636_v51 }
 0x240   :  { %v1844_v0 = vadd.f32 %v2406_v59, %v1740_v60 }
 0x242   :  { %v1852_v1 = vadd.f32 %v2125_v61, %v1844_v0 }
 0x244   :  { %vm1853_vm2 = vcmp.ge.f32.partialorder %v1852_v1, 1.0 }
 0x245   :  { %v2126_v2 = vsel %vm1853_vm2, 1.0, %v2700_v3 }
 0x246   :  { %1856 = vst [vmem:[%s3877_s5] sm:$0xff] %v2126_v2 }

</bundles_post_ra>
